<compile_context>
chip_gen: v6e
topology: v6e:2x2x1
jax: 0.10.0
libtpu: 0.0.40
codegen_flags: <defaults>
</compile_context>

<pallas_src>
import math

import jax
import jax.numpy as jnp
import numpy as np
from jax import lax
from jax.experimental import pallas as pl
from jax.experimental.pallas import tpu as pltpu

D_MODEL = 32
D_FF = 64
HEADS = 4
DK = D_MODEL // HEADS
EPS = 1e-6


# ------------------------- host-side mask builders --------------------------
def _head_col_mask(rows_per_head, n_masked_slots):
    """For head-tiled rows: keep only head-h columns of each packed K/V slot."""
    total_cols = n_masked_slots * D_MODEL
    m = np.zeros((HEADS * rows_per_head, total_cols), np.float32)
    for h in range(HEADS):
        r0 = h * rows_per_head
        for slot in range(n_masked_slots):
            c0 = slot * D_MODEL + h * DK
            m[r0:r0 + rows_per_head, c0:c0 + DK] = 1.0
    return m


def _batch_select_mask(bpb, s_q, s_kv):
    """1 where a query row and a (head, batch, key) column share the same batch."""
    rq, rk = bpb * s_q, bpb * s_kv
    m = np.zeros((rq, HEADS * rk), np.float32)
    for i in range(rq):
        b = i // s_q
        for h in range(HEADS):
            c0 = h * rk + b * s_kv
            m[i, c0:c0 + s_kv] = 1.0
    return m


def _block_sum_mat(bpb, s_kv):
    """Block-diagonal ones matrix: p @ M gives per-(head,batch) softmax denominators."""
    c = HEADS * bpb * s_kv
    m = np.zeros((c, c), np.float32)
    for blk in range(c // s_kv):
        m[blk * s_kv:(blk + 1) * s_kv, blk * s_kv:(blk + 1) * s_kv] = 1.0
    return m


# ------------------------------ kernel helpers -------------------------------
def _mm(a, b):
    # MXU matmul: bf16 operands, f32 accumulation.
    return jnp.dot(a.astype(jnp.bfloat16), b.astype(jnp.bfloat16),
                   preferred_element_type=jnp.float32)


def _mm_t(a, b):
    # a @ b.T (contract the last dims), no materialized transpose.
    return lax.dot_general(a.astype(jnp.bfloat16), b.astype(jnp.bfloat16),
                           (((1,), (1,)), ((), ())),
                           preferred_element_type=jnp.float32)


def _norm(x, gamma, beta):
    # Torch-style Norm: alpha * (x - mean) / (unbiased_std + eps) + bias
    d = x.shape[-1]
    mu = jnp.mean(x, axis=-1, keepdims=True)
    var = jnp.sum((x - mu) ** 2, axis=-1, keepdims=True) * (1.0 / (d - 1))
    inv = pl.reciprocal(jnp.sqrt(var) + EPS, approx=True)
    return gamma * (x - mu) * inv + beta


def _attn(q, k_bd, v_bd, batch_mask, block_sum):
    # q: (Rq, D) with 1/sqrt(dk) pre-folded into the Q projection.
    # k_bd/v_bd: (HEADS*Rk, D) head-masked slabs (row block h holds the full K/V
    # rows with only head-h columns kept).  One score matmul covers every
    # (head, batch) pair; the per-(head,batch) softmax denominator comes from a
    # block-diagonal ones matmul; cross-batch columns are zeroed after
    # normalization so the PV matmul only mixes same-batch, same-head keys.
    s = _mm_t(q, k_bd)                                # (Rq, HEADS*Rk)
    s = s - jnp.max(s, axis=-1, keepdims=True)        # shared row max (stable)
    p = jnp.exp(s)
    denom = _mm(p, block_sum)                         # per-lane block sums
    p = p * pl.reciprocal(denom, approx=True) * batch_mask
    return _mm(p, v_bd)                               # (Rq, D), heads in lanes


# ---------------------------------- kernel -----------------------------------
def encoder_layer_kernel(x_ref, y_ref,
                         hm_y_ref, hm_x2_ref,
                         bm_xy_ref, bsum_xy_ref, bm_yx_ref, bsum_yx_ref,
                         ln_g_ref, ln_b_ref,
                         Wqs_ref, bqs_ref,
                         Wy_ref, by_ref,
                         Wx2_ref, bx2_ref,
                         Wos_ref, bos_ref,
                         Wodx_ref, bodx_ref,
                         Wody_ref, body_ref,
                         W1_ref, b1_ref, W2_ref, b2_ref,
                         x_out_ref, y_out_ref):
    bpb, s_x, d = x_ref.shape
    _, s_y, _ = y_ref.shape

    # Fold the batch into the token/row axis (no relayout: leading dims only).
    x = jnp.concatenate([x_ref[i] for i in range(bpb)], axis=0)   # (rx, D)
    y = jnp.concatenate([y_ref[i] for i in range(bpb)], axis=0)   # (ry, D)

    ln_g, ln_b = ln_g_ref[...], ln_b_ref[...]
    bm_xy, bsum_xy = bm_xy_ref[...], bsum_xy_ref[...]
    bm_yx, bsum_yx = bm_yx_ref[...], bsum_yx_ref[...]

    # Every projection that reads y, as ONE (ry, D) x (D, 5D) matmul.
    # Packed columns: [K_s | V_s | K_dx | V_dx | Q_dy]  (Q columns pre-scaled).
    # K/V columns are then head-tiled + masked into block-diagonal slabs.
    yp = _mm(y, Wy_ref[...]) + by_ref[...]                              # (ry, 5D)
    kv_y = jnp.concatenate([yp[:, 0:4 * d]] * HEADS, axis=0) * hm_y_ref[...]
    k_s, v_s = kv_y[:, 0:d], kv_y[:, d:2 * d]
    k_dx, v_dx = kv_y[:, 2 * d:3 * d], kv_y[:, 3 * d:4 * d]
    q_dy = yp[:, 4 * d:5 * d]

    # ---- x2 = norm_1(x); x = s_attn(x2, y); x = x + dropout_1(x) -----------
    x2 = _norm(x, ln_g[0:1, :], ln_b[0:1, :])
    q_s = _mm(x2, Wqs_ref[...]) + bqs_ref[...]
    o_s = _attn(q_s, k_s, v_s, bm_xy, bsum_xy)
    o_s = _mm(o_s, Wos_ref[...]) + bos_ref[...]
    x = o_s + o_s                                     # dropout is identity

    # ---- x2 = norm_2(x); x, y = d_attn(x2, y); x = x + dropout_2(x) --------
    x2 = _norm(x, ln_g[1:2, :], ln_b[1:2, :])
    # Packed columns: [K_dy | V_dy | Q_dx] from ONE (rx, D) x (D, 3D) matmul.
    xp = _mm(x2, Wx2_ref[...]) + bx2_ref[...]                           # (rx, 3D)
    kv_x = jnp.concatenate([xp[:, 0:2 * d]] * HEADS, axis=0) * hm_x2_ref[...]
    k_dy, v_dy = kv_x[:, 0:d], kv_x[:, d:2 * d]
    q_dx = xp[:, 2 * d:3 * d]

    o_dx = _attn(q_dx, k_dx, v_dx, bm_xy, bsum_xy)
    o_dx = _mm(o_dx, Wodx_ref[...]) + bodx_ref[...]
    o_dy = _attn(q_dy, k_dy, v_dy, bm_yx, bsum_yx)
    o_dy = _mm(o_dy, Wody_ref[...]) + body_ref[...]
    x = o_dx + o_dx
    y_new = o_dy

    # ---- x2 = norm_3(x); x = x + dropout_3(ff(x2)) --------------------------
    x2 = _norm(x, ln_g[2:3, :], ln_b[2:3, :])
    h = jnp.maximum(_mm(x2, W1_ref[...]) + b1_ref[...], 0.0)
    x = x + _mm(h, W2_ref[...]) + b2_ref[...]

    for i in range(bpb):
        x_out_ref[i] = x[i * s_x:(i + 1) * s_x, :]
        y_out_ref[i] = y_new[i * s_y:(i + 1) * s_y, :]


# --------------------------------- wrapper -----------------------------------
def alternating_encoder_layer(x, y, params):
    B, S, D = x.shape
    _, Sy, _ = y.shape
    ln_g, ln_b, Ws, bs, Wdx, bdx, Wdy, bdy, W1, b1, W2, b2 = params

    # Fold the batch into the block; keep a 2-way "parallel" grid axis so both
    # v7x TensorCores get work (on v5e/v6e this is simply a 2-step loop).
    G = 2 if (B % 2 == 0 and B >= 2) else 1
    BPB = B // G
    Rx, Ry = BPB * S, BPB * Sy

    wdt = jnp.bfloat16   # matmul operands bf16, f32 accumulation in-kernel
    scale = 1.0 / math.sqrt(DK)   # folded into every Q projection host-side

    Wq_s = (scale * Ws[0]).astype(wdt)
    bq_s = (scale * bs[0]).reshape(1, D)
    Wy_pack = jnp.concatenate(
        [Ws[1], Ws[2], Wdx[1], Wdx[2], scale * Wdy[0]], axis=1).astype(wdt)
    by_pack = jnp.concatenate(
        [bs[1], bs[2], bdx[1], bdx[2], scale * bdy[0]], axis=0).reshape(1, 5 * D)
    Wx2_pack = jnp.concatenate(
        [Wdy[1], Wdy[2], scale * Wdx[0]], axis=1).astype(wdt)
    bx2_pack = jnp.concatenate(
        [bdy[1], bdy[2], scale * bdx[0]], axis=0).reshape(1, 3 * D)
    Wo_s, bo_s = Ws[3].astype(wdt), bs[3].reshape(1, D)
    Wo_dx, bo_dx = Wdx[3].astype(wdt), bdx[3].reshape(1, D)
    Wo_dy, bo_dy = Wdy[3].astype(wdt), bdy[3].reshape(1, D)
    W1b, W2b = W1.astype(wdt), W2.astype(wdt)

    hm_y = jnp.asarray(_head_col_mask(Ry, 4))                    # (H*Ry, 4D)
    hm_x2 = jnp.asarray(_head_col_mask(Rx, 2))                   # (H*Rx, 2D)
    bm_xy = jnp.asarray(_batch_select_mask(BPB, S, Sy))
    bsum_xy = jnp.asarray(_block_sum_mat(BPB, Sy)).astype(wdt)   # 0/1 exact in bf16
    bm_yx = jnp.asarray(_batch_select_mask(BPB, Sy, S))
    bsum_yx = jnp.asarray(_block_sum_mat(BPB, S)).astype(wdt)

    consts = (hm_y, hm_x2, bm_xy, bsum_xy, bm_yx, bsum_yx,
              ln_g, ln_b,
              Wq_s, bq_s, Wy_pack, by_pack, Wx2_pack, bx2_pack,
              Wo_s, bo_s, Wo_dx, bo_dx, Wo_dy, bo_dy,
              W1b, b1, W2b, b2)

    def full_spec(a):
        return pl.BlockSpec(a.shape, lambda g, _n=a.ndim: (0,) * _n)

    in_specs = [pl.BlockSpec((BPB, S, D), lambda g: (g, 0, 0)),
                pl.BlockSpec((BPB, Sy, D), lambda g: (g, 0, 0))]
    in_specs += [full_spec(a) for a in consts]

    out_specs = (pl.BlockSpec((BPB, S, D), lambda g: (g, 0, 0)),
                 pl.BlockSpec((BPB, Sy, D), lambda g: (g, 0, 0)))
    out_shape = (jax.ShapeDtypeStruct((B, S, D), jnp.float32),
                 jax.ShapeDtypeStruct((B, Sy, D), jnp.float32))

    return pl.pallas_call(
        encoder_layer_kernel,
        grid=(G,),
        in_specs=in_specs,
        out_specs=out_specs,
        out_shape=out_shape,
        compiler_params=pltpu.CompilerParams(dimension_semantics=("parallel",)),
    )(x, y, *consts)


# ----------------------------- pure-JAX reference ----------------------------
def ref_forward(x, y, params):
    ln_g, ln_b, Ws, bs, Wdx, bdx, Wdy, bdy, W1, b1, W2, b2 = params
    hp = jax.lax.Precision.HIGHEST

    def norm(x, g, bta):
        mu = x.mean(-1, keepdims=True)
        var = ((x - mu) ** 2).sum(-1, keepdims=True) / (x.shape[-1] - 1)
        return g * (x - mu) / (jnp.sqrt(var) + EPS) + bta

    def mha(xq, xkv, W, b):
        q = jnp.matmul(xq, W[0], precision=hp) + b[0]
        k = jnp.matmul(xkv, W[1], precision=hp) + b[1]
        v = jnp.matmul(xkv, W[2], precision=hp) + b[2]
        B_, Sq, _ = q.shape
        Sk = k.shape[1]
        qh = q.reshape(B_, Sq, HEADS, DK).transpose(0, 2, 1, 3)
        kh = k.reshape(B_, Sk, HEADS, DK).transpose(0, 2, 1, 3)
        vh = v.reshape(B_, Sk, HEADS, DK).transpose(0, 2, 1, 3)
        s = jnp.einsum('bhqd,bhkd->bhqk', qh, kh, precision=hp) / math.sqrt(DK)
        p = jax.nn.softmax(s, axis=-1)
        o = jnp.einsum('bhqk,bhkd->bhqd', p, vh, precision=hp)
        o = o.transpose(0, 2, 1, 3).reshape(B_, Sq, HEADS * DK)
        return jnp.matmul(o, W[3], precision=hp) + b[3]

    x2 = norm(x, ln_g[0], ln_b[0])
    xa = mha(x2, y, Ws, bs)
    x = xa + xa
    x2 = norm(x, ln_g[1], ln_b[1])
    xd = mha(x2, y, Wdx, bdx)
    yd = mha(y, x2, Wdy, bdy)
    x = xd + xd
    y = yd
    x2 = norm(x, ln_g[2], ln_b[2])
    h = jnp.maximum(jnp.matmul(x2, W1, precision=hp) + b1, 0.0)
    x = x + jnp.matmul(h, W2, precision=hp) + b2
    return x, y


# ------------------------------------ main ------------------------------------
def init_params(key):
    ks = jax.random.split(key, 8)
    scale = 1.0 / math.sqrt(D_MODEL)
    ln_g = jnp.ones((3, D_MODEL), jnp.float32)
    ln_b = jnp.zeros((3, D_MODEL), jnp.float32)
    Ws = scale * jax.random.normal(ks[0], (4, D_MODEL, D_MODEL), jnp.float32)
    bs = 0.01 * jax.random.normal(ks[1], (4, D_MODEL), jnp.float32)
    Wdx = scale * jax.random.normal(ks[2], (4, D_MODEL, D_MODEL), jnp.float32)
    bdx = 0.01 * jax.random.normal(ks[3], (4, D_MODEL), jnp.float32)
    Wdy = scale * jax.random.normal(ks[4], (4, D_MODEL, D_MODEL), jnp.float32)
    bdy = 0.01 * jax.random.normal(ks[5], (4, D_MODEL), jnp.float32)
    W1 = scale * jax.random.normal(ks[6], (D_MODEL, D_FF), jnp.float32)
    b1 = jnp.zeros((1, D_FF), jnp.float32)
    W2 = (1.0 / math.sqrt(D_FF)) * jax.random.normal(ks[7], (D_FF, D_MODEL), jnp.float32)
    b2 = jnp.zeros((1, D_MODEL), jnp.float32)
    return (ln_g, ln_b, Ws, bs, Wdx, bdx, Wdy, bdy, W1, b1, W2, b2)


if __name__ == "__main__":
    B, S, SY = 4, 8, 8
    key = jax.random.PRNGKey(0)
    kx, ky, kp = jax.random.split(key, 3)
    x = jax.random.normal(kx, (B, S, D_MODEL), jnp.float32)
    y = jax.random.normal(ky, (B, SY, D_MODEL), jnp.float32)
    params = init_params(kp)

    x_out, y_out = alternating_encoder_layer(x, y, params)
    jax.block_until_ready((x_out, y_out))

    x_ref, y_ref = ref_forward(x, y, params)
    # Kernel matmuls use bf16 operands (f32 accumulation) and EUP approximate
    # reciprocals; tolerance is sized for bf16 vs the f32-HIGHEST reference.
    np.testing.assert_allclose(np.asarray(x_out), np.asarray(x_ref), rtol=1e-1, atol=1e-1)
    np.testing.assert_allclose(np.asarray(y_out), np.asarray(y_ref), rtol=1e-1, atol=1e-1)

    print("KERNEL_OK")
</pallas_src>

<mosaic_0001>
module attributes {stable_mosaic.version = 11 : i64} {
  func.func @encoder_layer_kernel(%arg0: i32, %arg1: memref<2x8x32xf32, #tpu.memory_space<vmem>>, %arg2: memref<2x8x32xf32, #tpu.memory_space<vmem>>, %arg3: memref<64x128xf32, #tpu.memory_space<vmem>>, %arg4: memref<64x64xf32, #tpu.memory_space<vmem>>, %arg5: memref<16x64xf32, #tpu.memory_space<vmem>>, %arg6: memref<64x64xbf16, #tpu.memory_space<vmem>>, %arg7: memref<16x64xf32, #tpu.memory_space<vmem>>, %arg8: memref<64x64xbf16, #tpu.memory_space<vmem>>, %arg9: memref<3x32xf32, #tpu.memory_space<vmem>>, %arg10: memref<3x32xf32, #tpu.memory_space<vmem>>, %arg11: memref<32x32xbf16, #tpu.memory_space<vmem>>, %arg12: memref<1x32xf32, #tpu.memory_space<vmem>>, %arg13: memref<32x160xbf16, #tpu.memory_space<vmem>>, %arg14: memref<1x160xf32, #tpu.memory_space<vmem>>, %arg15: memref<32x96xbf16, #tpu.memory_space<vmem>>, %arg16: memref<1x96xf32, #tpu.memory_space<vmem>>, %arg17: memref<32x32xbf16, #tpu.memory_space<vmem>>, %arg18: memref<1x32xf32, #tpu.memory_space<vmem>>, %arg19: memref<32x32xbf16, #tpu.memory_space<vmem>>, %arg20: memref<1x32xf32, #tpu.memory_space<vmem>>, %arg21: memref<32x32xbf16, #tpu.memory_space<vmem>>, %arg22: memref<1x32xf32, #tpu.memory_space<vmem>>, %arg23: memref<32x64xbf16, #tpu.memory_space<vmem>>, %arg24: memref<1x64xf32, #tpu.memory_space<vmem>>, %arg25: memref<64x32xbf16, #tpu.memory_space<vmem>>, %arg26: memref<1x32xf32, #tpu.memory_space<vmem>>, %arg27: memref<2x8x32xf32, #tpu.memory_space<vmem>>, %arg28: memref<2x8x32xf32, #tpu.memory_space<vmem>>) attributes {dimension_semantics = [#tpu.dimension_semantics<parallel>], iteration_bounds = array<i64: 2>, scalar_prefetch = 0 : i64, scratch_operands = 0 : i64, tpu.core_type = #tpu.core_type<tc>, window_params = [{transform_indices = @transform_0, window_bounds = array<i64: 2, 8, 32>}, {transform_indices = @transform_1, window_bounds = array<i64: 2, 8, 32>}, {pipeline_mode = #tpu.pipeline_mode<synchronous>, transform_indices = @transform_2, window_bounds = array<i64: 64, 128>}, {pipeline_mode = #tpu.pipeline_mode<synchronous>, transform_indices = @transform_3, window_bounds = array<i64: 64, 64>}, {pipeline_mode = #tpu.pipeline_mode<synchronous>, transform_indices = @transform_4, window_bounds = array<i64: 16, 64>}, {pipeline_mode = #tpu.pipeline_mode<synchronous>, transform_indices = @transform_5, window_bounds = array<i64: 64, 64>}, {pipeline_mode = #tpu.pipeline_mode<synchronous>, transform_indices = @transform_6, window_bounds = array<i64: 16, 64>}, {pipeline_mode = #tpu.pipeline_mode<synchronous>, transform_indices = @transform_7, window_bounds = array<i64: 64, 64>}, {pipeline_mode = #tpu.pipeline_mode<synchronous>, transform_indices = @transform_8, window_bounds = array<i64: 3, 32>}, {pipeline_mode = #tpu.pipeline_mode<synchronous>, transform_indices = @transform_9, window_bounds = array<i64: 3, 32>}, {pipeline_mode = #tpu.pipeline_mode<synchronous>, transform_indices = @transform_10, window_bounds = array<i64: 32, 32>}, {pipeline_mode = #tpu.pipeline_mode<synchronous>, transform_indices = @transform_11, window_bounds = array<i64: 1, 32>}, {pipeline_mode = #tpu.pipeline_mode<synchronous>, transform_indices = @transform_12, window_bounds = array<i64: 32, 160>}, {pipeline_mode = #tpu.pipeline_mode<synchronous>, transform_indices = @transform_13, window_bounds = array<i64: 1, 160>}, {pipeline_mode = #tpu.pipeline_mode<synchronous>, transform_indices = @transform_14, window_bounds = array<i64: 32, 96>}, {pipeline_mode = #tpu.pipeline_mode<synchronous>, transform_indices = @transform_15, window_bounds = array<i64: 1, 96>}, {pipeline_mode = #tpu.pipeline_mode<synchronous>, transform_indices = @transform_16, window_bounds = array<i64: 32, 32>}, {pipeline_mode = #tpu.pipeline_mode<synchronous>, transform_indices = @transform_17, window_bounds = array<i64: 1, 32>}, {pipeline_mode = #tpu.pipeline_mode<synchronous>, transform_indices = @transform_18, window_bounds = array<i64: 32, 32>}, {pipeline_mode = #tpu.pipeline_mode<synchronous>, transform_indices = @transform_19, window_bounds = array<i64: 1, 32>}, {pipeline_mode = #tpu.pipeline_mode<synchronous>, transform_indices = @transform_20, window_bounds = array<i64: 32, 32>}, {pipeline_mode = #tpu.pipeline_mode<synchronous>, transform_indices = @transform_21, window_bounds = array<i64: 1, 32>}, {pipeline_mode = #tpu.pipeline_mode<synchronous>, transform_indices = @transform_22, window_bounds = array<i64: 32, 64>}, {pipeline_mode = #tpu.pipeline_mode<synchronous>, transform_indices = @transform_23, window_bounds = array<i64: 1, 64>}, {pipeline_mode = #tpu.pipeline_mode<synchronous>, transform_indices = @transform_24, window_bounds = array<i64: 64, 32>}, {pipeline_mode = #tpu.pipeline_mode<synchronous>, transform_indices = @transform_25, window_bounds = array<i64: 1, 32>}, {transform_indices = @transform_26, window_bounds = array<i64: 2, 8, 32>}, {transform_indices = @transform_27, window_bounds = array<i64: 2, 8, 32>}]} {
    %c0 = arith.constant 0 : index
    %c0_0 = arith.constant 0 : index
    %c0_1 = arith.constant 0 : index
    %0 = vector.load %arg1[%c0, %c0_0, %c0_1] : memref<2x8x32xf32, #tpu.memory_space<vmem>>, vector<1x8x32xf32>
    %1 = vector.shape_cast %0 : vector<1x8x32xf32> to vector<8x32xf32>
    %c1 = arith.constant 1 : index
    %c0_2 = arith.constant 0 : index
    %c0_3 = arith.constant 0 : index
    %2 = vector.load %arg1[%c1, %c0_2, %c0_3] : memref<2x8x32xf32, #tpu.memory_space<vmem>>, vector<1x8x32xf32>
    %3 = vector.shape_cast %2 : vector<1x8x32xf32> to vector<8x32xf32>
    %4 = tpu.concatenate %1, %3 in 0 : vector<8x32xf32>, vector<8x32xf32> -> vector<16x32xf32>
    %c0_4 = arith.constant 0 : index
    %c0_5 = arith.constant 0 : index
    %c0_6 = arith.constant 0 : index
    %5 = vector.load %arg2[%c0_4, %c0_5, %c0_6] : memref<2x8x32xf32, #tpu.memory_space<vmem>>, vector<1x8x32xf32>
    %6 = vector.shape_cast %5 : vector<1x8x32xf32> to vector<8x32xf32>
    %c1_7 = arith.constant 1 : index
    %c0_8 = arith.constant 0 : index
    %c0_9 = arith.constant 0 : index
    %7 = vector.load %arg2[%c1_7, %c0_8, %c0_9] : memref<2x8x32xf32, #tpu.memory_space<vmem>>, vector<1x8x32xf32>
    %8 = vector.shape_cast %7 : vector<1x8x32xf32> to vector<8x32xf32>
    %9 = tpu.concatenate %6, %8 in 0 : vector<8x32xf32>, vector<8x32xf32> -> vector<16x32xf32>
    %c0_10 = arith.constant 0 : index
    %c0_11 = arith.constant 0 : index
    %10 = vector.load %arg9[%c0_10, %c0_11] : memref<3x32xf32, #tpu.memory_space<vmem>>, vector<3x32xf32>
    %c0_12 = arith.constant 0 : index
    %c0_13 = arith.constant 0 : index
    %11 = vector.load %arg10[%c0_12, %c0_13] : memref<3x32xf32, #tpu.memory_space<vmem>>, vector<3x32xf32>
    %c0_14 = arith.constant 0 : index
    %c0_15 = arith.constant 0 : index
    %12 = vector.load %arg5[%c0_14, %c0_15] : memref<16x64xf32, #tpu.memory_space<vmem>>, vector<16x64xf32>
    %c0_16 = arith.constant 0 : index
    %c0_17 = arith.constant 0 : index
    %13 = vector.load %arg6[%c0_16, %c0_17] : memref<64x64xbf16, #tpu.memory_space<vmem>>, vector<64x64xbf16>
    %c0_18 = arith.constant 0 : index
    %c0_19 = arith.constant 0 : index
    %14 = vector.load %arg7[%c0_18, %c0_19] : memref<16x64xf32, #tpu.memory_space<vmem>>, vector<16x64xf32>
    %c0_20 = arith.constant 0 : index
    %c0_21 = arith.constant 0 : index
    %15 = vector.load %arg8[%c0_20, %c0_21] : memref<64x64xbf16, #tpu.memory_space<vmem>>, vector<64x64xbf16>
    %c0_22 = arith.constant 0 : index
    %c0_23 = arith.constant 0 : index
    %16 = vector.load %arg13[%c0_22, %c0_23] : memref<32x160xbf16, #tpu.memory_space<vmem>>, vector<32x160xbf16>
    %17 = arith.truncf %9 : vector<16x32xf32> to vector<16x32xbf16>
    %cst = arith.constant dense<0.000000e+00> : vector<16x160xf32>
    %18 = tpu.matmul %17, %16, %cst {dimension_numbers = #tpu.dot_dimension_numbers<[1], [0], [0], [1], [0, 0, 1, 1], [], []>} : vector<16x32xbf16>, vector<32x160xbf16>, vector<16x160xf32> -> vector<16x160xf32>
    %c0_24 = arith.constant 0 : index
    %c0_25 = arith.constant 0 : index
    %19 = vector.load %arg14[%c0_24, %c0_25] : memref<1x160xf32, #tpu.memory_space<vmem>>, vector<1x160xf32>
    %20 = vector.broadcast %19 : vector<1x160xf32> to vector<16x160xf32>
    %21 = arith.addf %18, %20 : vector<16x160xf32>
    %22 = vector.extract_strided_slice %21 {offsets = [0, 0], sizes = [16, 128], strides = [1, 1]} : vector<16x160xf32> to vector<16x128xf32>
    %23 = tpu.concatenate %22, %22, %22, %22 in 0 : vector<16x128xf32>, vector<16x128xf32>, vector<16x128xf32>, vector<16x128xf32> -> vector<64x128xf32>
    %c0_26 = arith.constant 0 : index
    %c0_27 = arith.constant 0 : index
    %24 = vector.load %arg3[%c0_26, %c0_27] : memref<64x128xf32, #tpu.memory_space<vmem>>, vector<64x128xf32>
    %25 = arith.mulf %23, %24 : vector<64x128xf32>
    %26 = vector.extract_strided_slice %25 {offsets = [0, 0], sizes = [64, 32], strides = [1, 1]} : vector<64x128xf32> to vector<64x32xf32>
    %27 = vector.extract_strided_slice %25 {offsets = [0, 32], sizes = [64, 32], strides = [1, 1]} : vector<64x128xf32> to vector<64x32xf32>
    %28 = vector.extract_strided_slice %25 {offsets = [0, 64], sizes = [64, 32], strides = [1, 1]} : vector<64x128xf32> to vector<64x32xf32>
    %29 = vector.extract_strided_slice %25 {offsets = [0, 96], sizes = [64, 32], strides = [1, 1]} : vector<64x128xf32> to vector<64x32xf32>
    %30 = vector.extract_strided_slice %21 {offsets = [0, 128], sizes = [16, 32], strides = [1, 1]} : vector<16x160xf32> to vector<16x32xf32>
    %31 = vector.extract_strided_slice %10 {offsets = [0, 0], sizes = [1, 32], strides = [1, 1]} : vector<3x32xf32> to vector<1x32xf32>
    %32 = vector.extract_strided_slice %11 {offsets = [0, 0], sizes = [1, 32], strides = [1, 1]} : vector<3x32xf32> to vector<1x32xf32>
    %cst_28 = arith.constant dense<0.000000e+00> : vector<16xf32>
    %33 = vector.multi_reduction <add>, %4, %cst_28 [1] : vector<16x32xf32> to vector<16xf32>
    %34 = vector.shape_cast %33 : vector<16xf32> to vector<16x1xf32>
    %cst_29 = arith.constant 3.200000e+01 : f32
    %35 = vector.broadcast %cst_29 : f32 to vector<16x1xf32>
    %36 = arith.divf %34, %35 : vector<16x1xf32>
    %37 = vector.broadcast %36 : vector<16x1xf32> to vector<16x32xf32>
    %38 = arith.subf %4, %37 : vector<16x32xf32>
    %39 = arith.mulf %38, %38 : vector<16x32xf32>
    %cst_30 = arith.constant dense<0.000000e+00> : vector<16xf32>
    %40 = vector.multi_reduction <add>, %39, %cst_30 [1] : vector<16x32xf32> to vector<16xf32>
    %41 = vector.shape_cast %40 : vector<16xf32> to vector<16x1xf32>
    %cst_31 = arith.constant 0.0322580636 : f32
    %42 = vector.broadcast %cst_31 : f32 to vector<16x1xf32>
    %43 = arith.mulf %41, %42 : vector<16x1xf32>
    %44 = math.sqrt %43 : vector<16x1xf32>
    %cst_32 = arith.constant 9.99999997E-7 : f32
    %45 = vector.broadcast %cst_32 : f32 to vector<16x1xf32>
    %46 = arith.addf %44, %45 : vector<16x1xf32>
    %47 = tpu.reciprocal %46 {approx = true} : vector<16x1xf32> -> vector<16x1xf32>
    %48 = vector.broadcast %36 : vector<16x1xf32> to vector<16x32xf32>
    %49 = arith.subf %4, %48 : vector<16x32xf32>
    %50 = vector.broadcast %31 : vector<1x32xf32> to vector<16x32xf32>
    %51 = arith.mulf %50, %49 : vector<16x32xf32>
    %52 = vector.broadcast %47 : vector<16x1xf32> to vector<16x32xf32>
    %53 = arith.mulf %51, %52 : vector<16x32xf32>
    %54 = vector.broadcast %32 : vector<1x32xf32> to vector<16x32xf32>
    %55 = arith.addf %53, %54 : vector<16x32xf32>
    %c0_33 = arith.constant 0 : index
    %c0_34 = arith.constant 0 : index
    %56 = vector.load %arg11[%c0_33, %c0_34] : memref<32x32xbf16, #tpu.memory_space<vmem>>, vector<32x32xbf16>
    %57 = arith.truncf %55 : vector<16x32xf32> to vector<16x32xbf16>
    %cst_35 = arith.constant dense<0.000000e+00> : vector<16x32xf32>
    %58 = tpu.matmul %57, %56, %cst_35 {dimension_numbers = #tpu.dot_dimension_numbers<[1], [0], [0], [1], [0, 0, 1, 1], [], []>} : vector<16x32xbf16>, vector<32x32xbf16>, vector<16x32xf32> -> vector<16x32xf32>
    %c0_36 = arith.constant 0 : index
    %c0_37 = arith.constant 0 : index
    %59 = vector.load %arg12[%c0_36, %c0_37] : memref<1x32xf32, #tpu.memory_space<vmem>>, vector<1x32xf32>
    %60 = vector.broadcast %59 : vector<1x32xf32> to vector<16x32xf32>
    %61 = arith.addf %58, %60 : vector<16x32xf32>
    %62 = arith.truncf %61 : vector<16x32xf32> to vector<16x32xbf16>
    %63 = arith.truncf %26 : vector<64x32xf32> to vector<64x32xbf16>
    %cst_38 = arith.constant dense<0.000000e+00> : vector<16x64xf32>
    %64 = tpu.matmul %62, %63, %cst_38 {dimension_numbers = #tpu.dot_dimension_numbers<[1], [1], [0], [0], [0, 0, 1, 0], [], []>} : vector<16x32xbf16>, vector<64x32xbf16>, vector<16x64xf32> -> vector<16x64xf32>
    %cst_39 = arith.constant dense<0xFF800000> : vector<16xf32>
    %65 = vector.multi_reduction <maximumf>, %64, %cst_39 [1] : vector<16x64xf32> to vector<16xf32>
    %66 = vector.shape_cast %65 : vector<16xf32> to vector<16x1xf32>
    %67 = vector.broadcast %66 : vector<16x1xf32> to vector<16x64xf32>
    %68 = arith.subf %64, %67 : vector<16x64xf32>
    %69 = math.exp %68 : vector<16x64xf32>
    %70 = arith.truncf %69 : vector<16x64xf32> to vector<16x64xbf16>
    %cst_40 = arith.constant dense<0.000000e+00> : vector<16x64xf32>
    %71 = tpu.matmul %70, %13, %cst_40 {dimension_numbers = #tpu.dot_dimension_numbers<[1], [0], [0], [1], [0, 0, 1, 1], [], []>} : vector<16x64xbf16>, vector<64x64xbf16>, vector<16x64xf32> -> vector<16x64xf32>
    %72 = tpu.reciprocal %71 {approx = true} : vector<16x64xf32> -> vector<16x64xf32>
    %73 = arith.mulf %69, %72 : vector<16x64xf32>
    %74 = arith.mulf %73, %12 : vector<16x64xf32>
    %75 = arith.truncf %74 : vector<16x64xf32> to vector<16x64xbf16>
    %76 = arith.truncf %27 : vector<64x32xf32> to vector<64x32xbf16>
    %cst_41 = arith.constant dense<0.000000e+00> : vector<16x32xf32>
    %77 = tpu.matmul %75, %76, %cst_41 {dimension_numbers = #tpu.dot_dimension_numbers<[1], [0], [0], [1], [0, 0, 1, 1], [], []>} : vector<16x64xbf16>, vector<64x32xbf16>, vector<16x32xf32> -> vector<16x32xf32>
    %c0_42 = arith.constant 0 : index
    %c0_43 = arith.constant 0 : index
    %78 = vector.load %arg17[%c0_42, %c0_43] : memref<32x32xbf16, #tpu.memory_space<vmem>>, vector<32x32xbf16>
    %79 = arith.truncf %77 : vector<16x32xf32> to vector<16x32xbf16>
    %cst_44 = arith.constant dense<0.000000e+00> : vector<16x32xf32>
    %80 = tpu.matmul %79, %78, %cst_44 {dimension_numbers = #tpu.dot_dimension_numbers<[1], [0], [0], [1], [0, 0, 1, 1], [], []>} : vector<16x32xbf16>, vector<32x32xbf16>, vector<16x32xf32> -> vector<16x32xf32>
    %c0_45 = arith.constant 0 : index
    %c0_46 = arith.constant 0 : index
    %81 = vector.load %arg18[%c0_45, %c0_46] : memref<1x32xf32, #tpu.memory_space<vmem>>, vector<1x32xf32>
    %82 = vector.broadcast %81 : vector<1x32xf32> to vector<16x32xf32>
    %83 = arith.addf %80, %82 : vector<16x32xf32>
    %84 = arith.addf %83, %83 : vector<16x32xf32>
    %85 = vector.extract_strided_slice %10 {offsets = [1, 0], sizes = [1, 32], strides = [1, 1]} : vector<3x32xf32> to vector<1x32xf32>
    %86 = vector.extract_strided_slice %11 {offsets = [1, 0], sizes = [1, 32], strides = [1, 1]} : vector<3x32xf32> to vector<1x32xf32>
    %cst_47 = arith.constant dense<0.000000e+00> : vector<16xf32>
    %87 = vector.multi_reduction <add>, %84, %cst_47 [1] : vector<16x32xf32> to vector<16xf32>
    %88 = vector.shape_cast %87 : vector<16xf32> to vector<16x1xf32>
    %cst_48 = arith.constant 3.200000e+01 : f32
    %89 = vector.broadcast %cst_48 : f32 to vector<16x1xf32>
    %90 = arith.divf %88, %89 : vector<16x1xf32>
    %91 = vector.broadcast %90 : vector<16x1xf32> to vector<16x32xf32>
    %92 = arith.subf %84, %91 : vector<16x32xf32>
    %93 = arith.mulf %92, %92 : vector<16x32xf32>
    %cst_49 = arith.constant dense<0.000000e+00> : vector<16xf32>
    %94 = vector.multi_reduction <add>, %93, %cst_49 [1] : vector<16x32xf32> to vector<16xf32>
    %95 = vector.shape_cast %94 : vector<16xf32> to vector<16x1xf32>
    %cst_50 = arith.constant 0.0322580636 : f32
    %96 = vector.broadcast %cst_50 : f32 to vector<16x1xf32>
    %97 = arith.mulf %95, %96 : vector<16x1xf32>
    %98 = math.sqrt %97 : vector<16x1xf32>
    %cst_51 = arith.constant 9.99999997E-7 : f32
    %99 = vector.broadcast %cst_51 : f32 to vector<16x1xf32>
    %100 = arith.addf %98, %99 : vector<16x1xf32>
    %101 = tpu.reciprocal %100 {approx = true} : vector<16x1xf32> -> vector<16x1xf32>
    %102 = vector.broadcast %90 : vector<16x1xf32> to vector<16x32xf32>
    %103 = arith.subf %84, %102 : vector<16x32xf32>
    %104 = vector.broadcast %85 : vector<1x32xf32> to vector<16x32xf32>
    %105 = arith.mulf %104, %103 : vector<16x32xf32>
    %106 = vector.broadcast %101 : vector<16x1xf32> to vector<16x32xf32>
    %107 = arith.mulf %105, %106 : vector<16x32xf32>
    %108 = vector.broadcast %86 : vector<1x32xf32> to vector<16x32xf32>
    %109 = arith.addf %107, %108 : vector<16x32xf32>
    %c0_52 = arith.constant 0 : index
    %c0_53 = arith.constant 0 : index
    %110 = vector.load %arg15[%c0_52, %c0_53] : memref<32x96xbf16, #tpu.memory_space<vmem>>, vector<32x96xbf16>
    %111 = arith.truncf %109 : vector<16x32xf32> to vector<16x32xbf16>
    %cst_54 = arith.constant dense<0.000000e+00> : vector<16x96xf32>
    %112 = tpu.matmul %111, %110, %cst_54 {dimension_numbers = #tpu.dot_dimension_numbers<[1], [0], [0], [1], [0, 0, 1, 1], [], []>} : vector<16x32xbf16>, vector<32x96xbf16>, vector<16x96xf32> -> vector<16x96xf32>
    %c0_55 = arith.constant 0 : index
    %c0_56 = arith.constant 0 : index
    %113 = vector.load %arg16[%c0_55, %c0_56] : memref<1x96xf32, #tpu.memory_space<vmem>>, vector<1x96xf32>
    %114 = vector.broadcast %113 : vector<1x96xf32> to vector<16x96xf32>
    %115 = arith.addf %112, %114 : vector<16x96xf32>
    %116 = vector.extract_strided_slice %115 {offsets = [0, 0], sizes = [16, 64], strides = [1, 1]} : vector<16x96xf32> to vector<16x64xf32>
    %117 = tpu.concatenate %116, %116, %116, %116 in 0 : vector<16x64xf32>, vector<16x64xf32>, vector<16x64xf32>, vector<16x64xf32> -> vector<64x64xf32>
    %c0_57 = arith.constant 0 : index
    %c0_58 = arith.constant 0 : index
    %118 = vector.load %arg4[%c0_57, %c0_58] : memref<64x64xf32, #tpu.memory_space<vmem>>, vector<64x64xf32>
    %119 = arith.mulf %117, %118 : vector<64x64xf32>
    %120 = vector.extract_strided_slice %119 {offsets = [0, 0], sizes = [64, 32], strides = [1, 1]} : vector<64x64xf32> to vector<64x32xf32>
    %121 = vector.extract_strided_slice %119 {offsets = [0, 32], sizes = [64, 32], strides = [1, 1]} : vector<64x64xf32> to vector<64x32xf32>
    %122 = vector.extract_strided_slice %115 {offsets = [0, 64], sizes = [16, 32], strides = [1, 1]} : vector<16x96xf32> to vector<16x32xf32>
    %123 = arith.truncf %122 : vector<16x32xf32> to vector<16x32xbf16>
    %124 = arith.truncf %28 : vector<64x32xf32> to vector<64x32xbf16>
    %cst_59 = arith.constant dense<0.000000e+00> : vector<16x64xf32>
    %125 = tpu.matmul %123, %124, %cst_59 {dimension_numbers = #tpu.dot_dimension_numbers<[1], [1], [0], [0], [0, 0, 1, 0], [], []>} : vector<16x32xbf16>, vector<64x32xbf16>, vector<16x64xf32> -> vector<16x64xf32>
    %cst_60 = arith.constant dense<0xFF800000> : vector<16xf32>
    %126 = vector.multi_reduction <maximumf>, %125, %cst_60 [1] : vector<16x64xf32> to vector<16xf32>
    %127 = vector.shape_cast %126 : vector<16xf32> to vector<16x1xf32>
    %128 = vector.broadcast %127 : vector<16x1xf32> to vector<16x64xf32>
    %129 = arith.subf %125, %128 : vector<16x64xf32>
    %130 = math.exp %129 : vector<16x64xf32>
    %131 = arith.truncf %130 : vector<16x64xf32> to vector<16x64xbf16>
    %cst_61 = arith.constant dense<0.000000e+00> : vector<16x64xf32>
    %132 = tpu.matmul %131, %13, %cst_61 {dimension_numbers = #tpu.dot_dimension_numbers<[1], [0], [0], [1], [0, 0, 1, 1], [], []>} : vector<16x64xbf16>, vector<64x64xbf16>, vector<16x64xf32> -> vector<16x64xf32>
    %133 = tpu.reciprocal %132 {approx = true} : vector<16x64xf32> -> vector<16x64xf32>
    %134 = arith.mulf %130, %133 : vector<16x64xf32>
    %135 = arith.mulf %134, %12 : vector<16x64xf32>
    %136 = arith.truncf %135 : vector<16x64xf32> to vector<16x64xbf16>
    %137 = arith.truncf %29 : vector<64x32xf32> to vector<64x32xbf16>
    %cst_62 = arith.constant dense<0.000000e+00> : vector<16x32xf32>
    %138 = tpu.matmul %136, %137, %cst_62 {dimension_numbers = #tpu.dot_dimension_numbers<[1], [0], [0], [1], [0, 0, 1, 1], [], []>} : vector<16x64xbf16>, vector<64x32xbf16>, vector<16x32xf32> -> vector<16x32xf32>
    %c0_63 = arith.constant 0 : index
    %c0_64 = arith.constant 0 : index
    %139 = vector.load %arg19[%c0_63, %c0_64] : memref<32x32xbf16, #tpu.memory_space<vmem>>, vector<32x32xbf16>
    %140 = arith.truncf %138 : vector<16x32xf32> to vector<16x32xbf16>
    %cst_65 = arith.constant dense<0.000000e+00> : vector<16x32xf32>
    %141 = tpu.matmul %140, %139, %cst_65 {dimension_numbers = #tpu.dot_dimension_numbers<[1], [0], [0], [1], [0, 0, 1, 1], [], []>} : vector<16x32xbf16>, vector<32x32xbf16>, vector<16x32xf32> -> vector<16x32xf32>
    %c0_66 = arith.constant 0 : index
    %c0_67 = arith.constant 0 : index
    %142 = vector.load %arg20[%c0_66, %c0_67] : memref<1x32xf32, #tpu.memory_space<vmem>>, vector<1x32xf32>
    %143 = vector.broadcast %142 : vector<1x32xf32> to vector<16x32xf32>
    %144 = arith.addf %141, %143 : vector<16x32xf32>
    %145 = arith.truncf %30 : vector<16x32xf32> to vector<16x32xbf16>
    %146 = arith.truncf %120 : vector<64x32xf32> to vector<64x32xbf16>
    %cst_68 = arith.constant dense<0.000000e+00> : vector<16x64xf32>
    %147 = tpu.matmul %145, %146, %cst_68 {dimension_numbers = #tpu.dot_dimension_numbers<[1], [1], [0], [0], [0, 0, 1, 0], [], []>} : vector<16x32xbf16>, vector<64x32xbf16>, vector<16x64xf32> -> vector<16x64xf32>
    %cst_69 = arith.constant dense<0xFF800000> : vector<16xf32>
    %148 = vector.multi_reduction <maximumf>, %147, %cst_69 [1] : vector<16x64xf32> to vector<16xf32>
    %149 = vector.shape_cast %148 : vector<16xf32> to vector<16x1xf32>
    %150 = vector.broadcast %149 : vector<16x1xf32> to vector<16x64xf32>
    %151 = arith.subf %147, %150 : vector<16x64xf32>
    %152 = math.exp %151 : vector<16x64xf32>
    %153 = arith.truncf %152 : vector<16x64xf32> to vector<16x64xbf16>
    %cst_70 = arith.constant dense<0.000000e+00> : vector<16x64xf32>
    %154 = tpu.matmul %153, %15, %cst_70 {dimension_numbers = #tpu.dot_dimension_numbers<[1], [0], [0], [1], [0, 0, 1, 1], [], []>} : vector<16x64xbf16>, vector<64x64xbf16>, vector<16x64xf32> -> vector<16x64xf32>
    %155 = tpu.reciprocal %154 {approx = true} : vector<16x64xf32> -> vector<16x64xf32>
    %156 = arith.mulf %152, %155 : vector<16x64xf32>
    %157 = arith.mulf %156, %14 : vector<16x64xf32>
    %158 = arith.truncf %157 : vector<16x64xf32> to vector<16x64xbf16>
    %159 = arith.truncf %121 : vector<64x32xf32> to vector<64x32xbf16>
    %cst_71 = arith.constant dense<0.000000e+00> : vector<16x32xf32>
    %160 = tpu.matmul %158, %159, %cst_71 {dimension_numbers = #tpu.dot_dimension_numbers<[1], [0], [0], [1], [0, 0, 1, 1], [], []>} : vector<16x64xbf16>, vector<64x32xbf16>, vector<16x32xf32> -> vector<16x32xf32>
    %c0_72 = arith.constant 0 : index
    %c0_73 = arith.constant 0 : index
    %161 = vector.load %arg21[%c0_72, %c0_73] : memref<32x32xbf16, #tpu.memory_space<vmem>>, vector<32x32xbf16>
    %162 = arith.truncf %160 : vector<16x32xf32> to vector<16x32xbf16>
    %cst_74 = arith.constant dense<0.000000e+00> : vector<16x32xf32>
    %163 = tpu.matmul %162, %161, %cst_74 {dimension_numbers = #tpu.dot_dimension_numbers<[1], [0], [0], [1], [0, 0, 1, 1], [], []>} : vector<16x32xbf16>, vector<32x32xbf16>, vector<16x32xf32> -> vector<16x32xf32>
    %c0_75 = arith.constant 0 : index
    %c0_76 = arith.constant 0 : index
    %164 = vector.load %arg22[%c0_75, %c0_76] : memref<1x32xf32, #tpu.memory_space<vmem>>, vector<1x32xf32>
    %165 = vector.broadcast %164 : vector<1x32xf32> to vector<16x32xf32>
    %166 = arith.addf %163, %165 : vector<16x32xf32>
    %167 = arith.addf %144, %144 : vector<16x32xf32>
    %168 = vector.extract_strided_slice %10 {offsets = [2, 0], sizes = [1, 32], strides = [1, 1]} : vector<3x32xf32> to vector<1x32xf32>
    %169 = vector.extract_strided_slice %11 {offsets = [2, 0], sizes = [1, 32], strides = [1, 1]} : vector<3x32xf32> to vector<1x32xf32>
    %cst_77 = arith.constant dense<0.000000e+00> : vector<16xf32>
    %170 = vector.multi_reduction <add>, %167, %cst_77 [1] : vector<16x32xf32> to vector<16xf32>
    %171 = vector.shape_cast %170 : vector<16xf32> to vector<16x1xf32>
    %cst_78 = arith.constant 3.200000e+01 : f32
    %172 = vector.broadcast %cst_78 : f32 to vector<16x1xf32>
    %173 = arith.divf %171, %172 : vector<16x1xf32>
    %174 = vector.broadcast %173 : vector<16x1xf32> to vector<16x32xf32>
    %175 = arith.subf %167, %174 : vector<16x32xf32>
    %176 = arith.mulf %175, %175 : vector<16x32xf32>
    %cst_79 = arith.constant dense<0.000000e+00> : vector<16xf32>
    %177 = vector.multi_reduction <add>, %176, %cst_79 [1] : vector<16x32xf32> to vector<16xf32>
    %178 = vector.shape_cast %177 : vector<16xf32> to vector<16x1xf32>
    %cst_80 = arith.constant 0.0322580636 : f32
    %179 = vector.broadcast %cst_80 : f32 to vector<16x1xf32>
    %180 = arith.mulf %178, %179 : vector<16x1xf32>
    %181 = math.sqrt %180 : vector<16x1xf32>
    %cst_81 = arith.constant 9.99999997E-7 : f32
    %182 = vector.broadcast %cst_81 : f32 to vector<16x1xf32>
    %183 = arith.addf %181, %182 : vector<16x1xf32>
    %184 = tpu.reciprocal %183 {approx = true} : vector<16x1xf32> -> vector<16x1xf32>
    %185 = vector.broadcast %173 : vector<16x1xf32> to vector<16x32xf32>
    %186 = arith.subf %167, %185 : vector<16x32xf32>
    %187 = vector.broadcast %168 : vector<1x32xf32> to vector<16x32xf32>
    %188 = arith.mulf %187, %186 : vector<16x32xf32>
    %189 = vector.broadcast %184 : vector<16x1xf32> to vector<16x32xf32>
    %190 = arith.mulf %188, %189 : vector<16x32xf32>
    %191 = vector.broadcast %169 : vector<1x32xf32> to vector<16x32xf32>
    %192 = arith.addf %190, %191 : vector<16x32xf32>
    %c0_82 = arith.constant 0 : index
    %c0_83 = arith.constant 0 : index
    %193 = vector.load %arg23[%c0_82, %c0_83] : memref<32x64xbf16, #tpu.memory_space<vmem>>, vector<32x64xbf16>
    %194 = arith.truncf %192 : vector<16x32xf32> to vector<16x32xbf16>
    %cst_84 = arith.constant dense<0.000000e+00> : vector<16x64xf32>
    %195 = tpu.matmul %194, %193, %cst_84 {dimension_numbers = #tpu.dot_dimension_numbers<[1], [0], [0], [1], [0, 0, 1, 1], [], []>} : vector<16x32xbf16>, vector<32x64xbf16>, vector<16x64xf32> -> vector<16x64xf32>
    %c0_85 = arith.constant 0 : index
    %c0_86 = arith.constant 0 : index
    %196 = vector.load %arg24[%c0_85, %c0_86] : memref<1x64xf32, #tpu.memory_space<vmem>>, vector<1x64xf32>
    %197 = vector.broadcast %196 : vector<1x64xf32> to vector<16x64xf32>
    %198 = arith.addf %195, %197 : vector<16x64xf32>
    %cst_87 = arith.constant 0.000000e+00 : f32
    %199 = vector.broadcast %cst_87 : f32 to vector<16x64xf32>
    %200 = arith.maximumf %198, %199 : vector<16x64xf32>
    %c0_88 = arith.constant 0 : index
    %c0_89 = arith.constant 0 : index
    %201 = vector.load %arg25[%c0_88, %c0_89] : memref<64x32xbf16, #tpu.memory_space<vmem>>, vector<64x32xbf16>
    %202 = arith.truncf %200 : vector<16x64xf32> to vector<16x64xbf16>
    %cst_90 = arith.constant dense<0.000000e+00> : vector<16x32xf32>
    %203 = tpu.matmul %202, %201, %cst_90 {dimension_numbers = #tpu.dot_dimension_numbers<[1], [0], [0], [1], [0, 0, 1, 1], [], []>} : vector<16x64xbf16>, vector<64x32xbf16>, vector<16x32xf32> -> vector<16x32xf32>
    %204 = arith.addf %167, %203 : vector<16x32xf32>
    %c0_91 = arith.constant 0 : index
    %c0_92 = arith.constant 0 : index
    %205 = vector.load %arg26[%c0_91, %c0_92] : memref<1x32xf32, #tpu.memory_space<vmem>>, vector<1x32xf32>
    %206 = vector.broadcast %205 : vector<1x32xf32> to vector<16x32xf32>
    %207 = arith.addf %204, %206 : vector<16x32xf32>
    %208 = vector.extract_strided_slice %207 {offsets = [0, 0], sizes = [8, 32], strides = [1, 1]} : vector<16x32xf32> to vector<8x32xf32>
    %c0_93 = arith.constant 0 : index
    %c0_94 = arith.constant 0 : index
    %c0_95 = arith.constant 0 : index
    %209 = vector.load %arg27[%c0_93, %c0_94, %c0_95] : memref<2x8x32xf32, #tpu.memory_space<vmem>>, vector<1x8x32xf32>
    %210 = vector.shape_cast %209 : vector<1x8x32xf32> to vector<8x32xf32>
    %211 = vector.shape_cast %208 : vector<8x32xf32> to vector<1x8x32xf32>
    tpu.vector_store %arg27[%c0_93, %c0_94, %c0_95], %211 {strides = array<i32>} : memref<2x8x32xf32, #tpu.memory_space<vmem>>, vector<1x8x32xf32>,
    %212 = vector.extract_strided_slice %166 {offsets = [0, 0], sizes = [8, 32], strides = [1, 1]} : vector<16x32xf32> to vector<8x32xf32>
    %c0_96 = arith.constant 0 : index
    %c0_97 = arith.constant 0 : index
    %c0_98 = arith.constant 0 : index
    %213 = vector.load %arg28[%c0_96, %c0_97, %c0_98] : memref<2x8x32xf32, #tpu.memory_space<vmem>>, vector<1x8x32xf32>
    %214 = vector.shape_cast %213 : vector<1x8x32xf32> to vector<8x32xf32>
    %215 = vector.shape_cast %212 : vector<8x32xf32> to vector<1x8x32xf32>
    tpu.vector_store %arg28[%c0_96, %c0_97, %c0_98], %215 {strides = array<i32>} : memref<2x8x32xf32, #tpu.memory_space<vmem>>, vector<1x8x32xf32>,
    %216 = vector.extract_strided_slice %207 {offsets = [8, 0], sizes = [8, 32], strides = [1, 1]} : vector<16x32xf32> to vector<8x32xf32>
    %c1_99 = arith.constant 1 : index
    %c0_100 = arith.constant 0 : index
    %c0_101 = arith.constant 0 : index
    %217 = vector.load %arg27[%c1_99, %c0_100, %c0_101] : memref<2x8x32xf32, #tpu.memory_space<vmem>>, vector<1x8x32xf32>
    %218 = vector.shape_cast %217 : vector<1x8x32xf32> to vector<8x32xf32>
    %219 = vector.shape_cast %216 : vector<8x32xf32> to vector<1x8x32xf32>
    tpu.vector_store %arg27[%c1_99, %c0_100, %c0_101], %219 {strides = array<i32>} : memref<2x8x32xf32, #tpu.memory_space<vmem>>, vector<1x8x32xf32>,
    %220 = vector.extract_strided_slice %166 {offsets = [8, 0], sizes = [8, 32], strides = [1, 1]} : vector<16x32xf32> to vector<8x32xf32>
    %c1_102 = arith.constant 1 : index
    %c0_103 = arith.constant 0 : index
    %c0_104 = arith.constant 0 : index
    %221 = vector.load %arg28[%c1_102, %c0_103, %c0_104] : memref<2x8x32xf32, #tpu.memory_space<vmem>>, vector<1x8x32xf32>
    %222 = vector.shape_cast %221 : vector<1x8x32xf32> to vector<8x32xf32>
    %223 = vector.shape_cast %220 : vector<8x32xf32> to vector<1x8x32xf32>
    tpu.vector_store %arg28[%c1_102, %c0_103, %c0_104], %223 {strides = array<i32>} : memref<2x8x32xf32, #tpu.memory_space<vmem>>, vector<1x8x32xf32>,
    return
  }
  func.func @transform_0(%arg0: i32) -> (i32, i32, i32) {
    %c0_i32 = arith.constant 0 : i32
    %c0_i32_0 = arith.constant 0 : i32
    %c0_i32_1 = arith.constant 0 : i32
    return %arg0, %c0_i32, %c0_i32_0 : i32, i32, i32
  }
  func.func @transform_1(%arg0: i32) -> (i32, i32, i32) {
    %c0_i32 = arith.constant 0 : i32
    %c0_i32_0 = arith.constant 0 : i32
    %c0_i32_1 = arith.constant 0 : i32
    return %arg0, %c0_i32, %c0_i32_0 : i32, i32, i32
  }
  func.func @transform_2(%arg0: i32) -> (i32, i32) {
    %c0_i32 = arith.constant 0 : i32
    %c0_i32_0 = arith.constant 0 : i32
    %c0_i32_1 = arith.constant 0 : i32
    return %c0_i32, %c0_i32_0 : i32, i32
  }
  func.func @transform_3(%arg0: i32) -> (i32, i32) {
    %c0_i32 = arith.constant 0 : i32
    %c0_i32_0 = arith.constant 0 : i32
    %c0_i32_1 = arith.constant 0 : i32
    return %c0_i32, %c0_i32_0 : i32, i32
  }
  func.func @transform_4(%arg0: i32) -> (i32, i32) {
    %c0_i32 = arith.constant 0 : i32
    %c0_i32_0 = arith.constant 0 : i32
    %c0_i32_1 = arith.constant 0 : i32
    return %c0_i32, %c0_i32_0 : i32, i32
  }
  func.func @transform_5(%arg0: i32) -> (i32, i32) {
    %c0_i32 = arith.constant 0 : i32
    %c0_i32_0 = arith.constant 0 : i32
    %c0_i32_1 = arith.constant 0 : i32
    return %c0_i32, %c0_i32_0 : i32, i32
  }
  func.func @transform_6(%arg0: i32) -> (i32, i32) {
    %c0_i32 = arith.constant 0 : i32
    %c0_i32_0 = arith.constant 0 : i32
    %c0_i32_1 = arith.constant 0 : i32
    return %c0_i32, %c0_i32_0 : i32, i32
  }
  func.func @transform_7(%arg0: i32) -> (i32, i32) {
    %c0_i32 = arith.constant 0 : i32
    %c0_i32_0 = arith.constant 0 : i32
    %c0_i32_1 = arith.constant 0 : i32
    return %c0_i32, %c0_i32_0 : i32, i32
  }
  func.func @transform_8(%arg0: i32) -> (i32, i32) {
    %c0_i32 = arith.constant 0 : i32
    %c0_i32_0 = arith.constant 0 : i32
    %c0_i32_1 = arith.constant 0 : i32
    return %c0_i32, %c0_i32_0 : i32, i32
  }
  func.func @transform_9(%arg0: i32) -> (i32, i32) {
    %c0_i32 = arith.constant 0 : i32
    %c0_i32_0 = arith.constant 0 : i32
    %c0_i32_1 = arith.constant 0 : i32
    return %c0_i32, %c0_i32_0 : i32, i32
  }
  func.func @transform_10(%arg0: i32) -> (i32, i32) {
    %c0_i32 = arith.constant 0 : i32
    %c0_i32_0 = arith.constant 0 : i32
    %c0_i32_1 = arith.constant 0 : i32
    return %c0_i32, %c0_i32_0 : i32, i32
  }
  func.func @transform_11(%arg0: i32) -> (i32, i32) {
    %c0_i32 = arith.constant 0 : i32
    %c0_i32_0 = arith.constant 0 : i32
    %c0_i32_1 = arith.constant 0 : i32
    return %c0_i32, %c0_i32_0 : i32, i32
  }
  func.func @transform_12(%arg0: i32) -> (i32, i32) {
    %c0_i32 = arith.constant 0 : i32
    %c0_i32_0 = arith.constant 0 : i32
    %c0_i32_1 = arith.constant 0 : i32
    return %c0_i32, %c0_i32_0 : i32, i32
  }
  func.func @transform_13(%arg0: i32) -> (i32, i32) {
    %c0_i32 = arith.constant 0 : i32
    %c0_i32_0 = arith.constant 0 : i32
    %c0_i32_1 = arith.constant 0 : i32
    return %c0_i32, %c0_i32_0 : i32, i32
  }
  func.func @transform_14(%arg0: i32) -> (i32, i32) {
    %c0_i32 = arith.constant 0 : i32
    %c0_i32_0 = arith.constant 0 : i32
    %c0_i32_1 = arith.constant 0 : i32
    return %c0_i32, %c0_i32_0 : i32, i32
  }
  func.func @transform_15(%arg0: i32) -> (i32, i32) {
    %c0_i32 = arith.constant 0 : i32
    %c0_i32_0 = arith.constant 0 : i32
    %c0_i32_1 = arith.constant 0 : i32
    return %c0_i32, %c0_i32_0 : i32, i32
  }
  func.func @transform_16(%arg0: i32) -> (i32, i32) {
    %c0_i32 = arith.constant 0 : i32
    %c0_i32_0 = arith.constant 0 : i32
    %c0_i32_1 = arith.constant 0 : i32
    return %c0_i32, %c0_i32_0 : i32, i32
  }
  func.func @transform_17(%arg0: i32) -> (i32, i32) {
    %c0_i32 = arith.constant 0 : i32
    %c0_i32_0 = arith.constant 0 : i32
    %c0_i32_1 = arith.constant 0 : i32
    return %c0_i32, %c0_i32_0 : i32, i32
  }
  func.func @transform_18(%arg0: i32) -> (i32, i32) {
    %c0_i32 = arith.constant 0 : i32
    %c0_i32_0 = arith.constant 0 : i32
    %c0_i32_1 = arith.constant 0 : i32
    return %c0_i32, %c0_i32_0 : i32, i32
  }
  func.func @transform_19(%arg0: i32) -> (i32, i32) {
    %c0_i32 = arith.constant 0 : i32
    %c0_i32_0 = arith.constant 0 : i32
    %c0_i32_1 = arith.constant 0 : i32
    return %c0_i32, %c0_i32_0 : i32, i32
  }
  func.func @transform_20(%arg0: i32) -> (i32, i32) {
    %c0_i32 = arith.constant 0 : i32
    %c0_i32_0 = arith.constant 0 : i32
    %c0_i32_1 = arith.constant 0 : i32
    return %c0_i32, %c0_i32_0 : i32, i32
  }
  func.func @transform_21(%arg0: i32) -> (i32, i32) {
    %c0_i32 = arith.constant 0 : i32
    %c0_i32_0 = arith.constant 0 : i32
    %c0_i32_1 = arith.constant 0 : i32
    return %c0_i32, %c0_i32_0 : i32, i32
  }
  func.func @transform_22(%arg0: i32) -> (i32, i32) {
    %c0_i32 = arith.constant 0 : i32
    %c0_i32_0 = arith.constant 0 : i32
    %c0_i32_1 = arith.constant 0 : i32
    return %c0_i32, %c0_i32_0 : i32, i32
  }
  func.func @transform_23(%arg0: i32) -> (i32, i32) {
    %c0_i32 = arith.constant 0 : i32
    %c0_i32_0 = arith.constant 0 : i32
    %c0_i32_1 = arith.constant 0 : i32
    return %c0_i32, %c0_i32_0 : i32, i32
  }
  func.func @transform_24(%arg0: i32) -> (i32, i32) {
    %c0_i32 = arith.constant 0 : i32
    %c0_i32_0 = arith.constant 0 : i32
    %c0_i32_1 = arith.constant 0 : i32
    return %c0_i32, %c0_i32_0 : i32, i32
  }
  func.func @transform_25(%arg0: i32) -> (i32, i32) {
    %c0_i32 = arith.constant 0 : i32
    %c0_i32_0 = arith.constant 0 : i32
    %c0_i32_1 = arith.constant 0 : i32
    return %c0_i32, %c0_i32_0 : i32, i32
  }
  func.func @transform_26(%arg0: i32) -> (i32, i32, i32) {
    %c0_i32 = arith.constant 0 : i32
    %c0_i32_0 = arith.constant 0 : i32
    %c0_i32_1 = arith.constant 0 : i32
    return %arg0, %c0_i32, %c0_i32_0 : i32, i32, i32
  }
  func.func @transform_27(%arg0: i32) -> (i32, i32, i32) {
    %c0_i32 = arith.constant 0 : i32
    %c0_i32_0 = arith.constant 0 : i32
    %c0_i32_1 = arith.constant 0 : i32
    return %arg0, %c0_i32, %c0_i32_0 : i32, i32, i32
  }
}

</mosaic_0001>

<bundles_post_ra>
// kernel: tpu_custom_call.1
= control target key start
LH: loop header
LB: loop body
LE: loop exit
PB: predicated region body
PF: predicated region fallthrough
CT: control target
= control target key end

     0   :  { %s5090_s0 = inlined_call_operand.vmem [shape: f32[4,8,32], index: 0, kind: input, shape index: {}]   ;;  %s5091_s1 = inlined_call_operand.hbm [shape: f32[4,8,32], index: 1, kind: input, shape index: {}]   ;;  %s5092_s2 = inlined_call_operand.hbm [shape: f32[64,128], index: 2, kind: input, shape index: {}]   ;;  %s5093_s3 = inlined_call_operand.hbm [shape: f32[64,64], index: 3, kind: input, shape index: {}]   ;;  %s5094_s4 = inlined_call_operand.hbm [shape: f32[16,64], index: 4, kind: input, shape index: {}]   ;;  %s5095_s5 = inlined_call_operand.hbm [shape: bf16[64,64], index: 5, kind: input, shape index: {}]   ;;  %s5096_s6 = inlined_call_operand.hbm [shape: f32[16,64], index: 6, kind: input, shape index: {}]   ;;  %s5097_s7 = inlined_call_operand.hbm [shape: bf16[64,64], index: 7, kind: input, shape index: {}]   ;;  %s5098_s8 = inlined_call_operand.hbm [shape: f32[3,32], index: 8, kind: input, shape index: {}]   ;;  %s5099_s9 = inlined_call_operand.hbm [shape: f32[3,32], index: 9, kind: input, shape index: {}]   ;;  %s5100_s10 = inlined_call_operand.hbm [shape: bf16[32,32], index: 10, kind: input, shape index: {}]   ;;  %s5101_s11 = inlined_call_operand.hbm [shape: f32[1,32], index: 11, kind: input, shape index: {}]   ;;  %s5102_s12 = inlined_call_operand.vmem [shape: bf16[32,160], index: 12, kind: input, shape index: {}]   ;;  %s5103_s13 = inlined_call_operand.hbm [shape: f32[1,160], index: 13, kind: input, shape index: {}]   ;;  %s5104_s14 = inlined_call_operand.hbm [shape: bf16[32,96], index: 14, kind: input, shape index: {}]   ;;  %s5105_s15 = inlined_call_operand.hbm [shape: f32[1,96], index: 15, kind: input, shape index: {}]   ;;  %s5106_s16 = inlined_call_operand.hbm [shape: bf16[32,32], index: 16, kind: input, shape index: {}]   ;;  %s5107_s17 = inlined_call_operand.hbm [shape: f32[1,32], index: 17, kind: input, shape index: {}]   ;;  %s5108_s18 = inlined_call_operand.hbm [shape: bf16[32,32], index: 18, kind: input, shape index: {}]   ;;  %s5109_s19 = inlined_call_operand.vmem [shape: f32[1,32], index: 19, kind: input, shape index: {}]   ;;  %s5110_s20 = inlined_call_operand.hbm [shape: bf16[32,32], index: 20, kind: input, shape index: {}]   ;;  %s5111_s21 = inlined_call_operand.vmem [shape: f32[1,32], index: 21, kind: input, shape index: {}]   ;;  %s5112_s22 = inlined_call_operand.hbm [shape: bf16[32,64], index: 22, kind: input, shape index: {}]   ;;  %s5113_s23 = inlined_call_operand.vmem [shape: f32[1,64], index: 23, kind: input, shape index: {}]   ;;  %s5114_s24 = inlined_call_operand.vmem [shape: bf16[64,32], index: 24, kind: input, shape index: {}]   ;;  %s5115_s25 = inlined_call_operand.vmem [shape: f32[1,32], index: 25, kind: input, shape index: {}]   ;;  %s5116_s26 = inlined_call_operand.hbm [shape: f32[4,8,32], index: 26, kind: output, shape index: {0}]   ;;  %s5117_s27 = inlined_call_operand.hbm [shape: f32[4,8,32], index: 27, kind: output, shape index: {1}]  }
   0x1   :  { %5133 = sst [smem:[#allocation47_spill]] %s5090_s0 }
   0x2   :  { %5134 = sst [smem:[#allocation48_spill]] %s5091_s1 }
   0x3   :  { %5135 = sst [smem:[#allocation49_spill]] %s5092_s2 }
   0x4   :  { %5136 = sst [smem:[#allocation50_spill]] %s5093_s3 }
   0x5   :  { %5137 = sst [smem:[#allocation51_spill]] %s5094_s4 }
   0x6   :  { %5138 = sst [smem:[#allocation52_spill]] %s5095_s5 }
   0x7   :  { %5139 = sst [smem:[#allocation53_spill]] %s5096_s6 }
   0x8   :  { %5140 = sst [smem:[#allocation54_spill]] %s5097_s7 }
   0x9   :  { %5141 = sst [smem:[#allocation55_spill]] %s5098_s8 }
   0xa   :  { %5142 = sst [smem:[#allocation56_spill]] %s5099_s9 }
   0xb   :  { %5143 = sst [smem:[#allocation57_spill]] %s5100_s10 }
   0xc   :  { %5144 = sst [smem:[#allocation58_spill]] %s5101_s11 }
   0xd   :  { %5145 = sst [smem:[#allocation59_spill]] %s5103_s13 }
   0xe   :  { %5146 = sst [smem:[#allocation60_spill]] %s5104_s14 }
   0xf   :  { %5147 = sst [smem:[#allocation61_spill]] %s5105_s15 }
  0x10   :  { %5148 = sst [smem:[#allocation62_spill]] %s5106_s16 }
  0x11   :  { %5149 = sst [smem:[#allocation63_spill]] %s5107_s17 }
  0x12   :  { %5150 = sst [smem:[#allocation64_spill]] %s5108_s18 }
  0x13   :  { %5151 = sst [smem:[#allocation65_spill]] %s5110_s20 }
  0x14   :  { %5152 = sst [smem:[#allocation66_spill]] %s5111_s21 }
  0x15   :  { %5153 = sst [smem:[#allocation67_spill]] %s5112_s22 }
  0x16   :  { %5154 = sst [smem:[#allocation68_spill]] %s5115_s25 }
  0x17   :  { %5155 = sst [smem:[#allocation69_spill]] %s5116_s26 }
  0x18   :  { %5156 = sst [smem:[#allocation70_spill]] %s5117_s27 }
  0x19   :  { %33 = vsyncpa [#allocation3], 0 }
  0x1a   :  { %35 = vsyncpa [#allocation3 + $0x1], 0 }
  0x1b   :  { %36 = vsyncpa [#allocation6], 0 }
  0x1c   :  { %37 = vsyncpa [#allocation9], 0 }
  0x1d   :  { %38 = vsyncpa [#allocation12], 0 }
  0x1e   :  { %39 = vsyncpa [#allocation15], 0 }
  0x1f   :  { %40 = vsyncpa [#allocation18], 0 }
  0x20   :  { %41 = vsyncpa [#allocation21], 0 }
  0x21   :  { %42 = vsyncpa [#allocation24], 0 }
  0x22   :  { %43 = vsyncpa [#allocation27], 0 }
  0x23   :  { %44 = vsyncpa [#allocation30], 0 }
  0x24   :  { %45 = vsyncpa [#allocation4], 0 }
  0x25   :  { %47 = vsyncpa [#allocation4 + $0x1], 0 }
  0x26   :  { %48 = vsyncpa [#allocation34], 0 }
  0x27   :  { %50 = vsyncpa [#allocation34 + $0x1], 0  ;;  %s4336_s7 = smov 0   ;;  %s4338_s4 = smov 0  }
  0x28   :  { %s4340_s8 = smov 0   ;;  %s4342_s30 = smov 0  }
  0x29 LB: > { %s4163_s9 = smov [#allocation5]   ;;  %s4357_s28 = sadd.s32 4294967295, %s4161_s30   ;;  %s4161_s30 = sphi %s4342_s30, %s5220_s30   ;;  %s4157_s8 = sphi %s4340_s8, %s5219_s8   ;;  %s4153_s4 = sphi %s4338_s4, %s5218_s4   ;;  %s4149_s7 = sphi %s4336_s7, %s5217_s7  }
  0x2a   : > { %s681_s5 = sshll.u32 %s4163_s9, 4  ;;  %p2863_p0 = scmp.ge.s32.totalorder %s4161_s30, 1  ;;  %s682_s5 = int_to_ptr.vmem [resolvable:$true] %s681_s5 }
  0x2b   : > { %p5125_p1 = scmp.eq.s32.totalorder %s4357_s28, 0  ;;  %p669_p2 = scmp.lt.s32.totalorder %s4161_s30, 3 }
  0x2c   : > { %s4164_s10 = smov [#allocation8]   ;;  %s4165_s6 = smov [#allocation11]  }
  0x2d   : > { %p4362_p3 = pnand %p2863_p0, %p669_p2  ;;  %s707_s29 = sshll.u32 %s4164_s10, 4  ;;  %s4375_s29 = int_to_ptr.vmem [resolvable:$true] %s707_s29 }
  0x2e   : > { %s733_s11 = sshll.u32 %s4165_s6, 4  ;;  %s3546_s3 = scalar_lea.vmem %s682_s5, 1024  ;;  %s4377_s11 = int_to_ptr.vmem [resolvable:$true] %s733_s11 }
  0x2f   : > { %s5157_s0 = scalar_select %p4362_p3, 1, 0 }
  0x30   : > { %p3291_p5 = pneg %p4362_p3  ;;  %p3547_p8 = scmp.ne.s32.totalorder %s682_s5, %s3546_s3 }
  0x31   : > { %p3554_p11 = scmp.lt.s32.totalorder %s682_s5, %s682_s5  ;;  %p3555_p12 = scmp.lt.s32.totalorder %s3546_s3, %s3546_s3 }
  0x32   : > { %p4371_p6 = pnand %p3291_p5, %p5125_p1 }
  0x33   : > { %p3556_p13 = por %p3555_p12, %p3554_p11 }
  0x34   : > { %p4381_p7 = pneg %p4371_p6 }
  0x36   : > { %p3549_p9 = pnand %p3547_p8, %p4381_p7 }
  0x38   : > { %p3550_p10 = pneg %p3549_p9 }
  0x3a   : > { %p3557_p0 = pnand %p3556_p13, %p3550_p10 }
  0x3c   : > { %3560 = shalt.err (!%p3557_p0)
}
  0x3d   : > { %s5121_s9 = smov 128   ;;  %s5123_s10 = smov 8  }
  0x3e   : > { %s5160_s25 = sld [smem:[#allocation49_spill]]  ;;  %s3572_s27 = scalar_lea.vmem %s4375_s29, 256 }
  0x3f   : > { %p3573_p2 = scmp.ne.s32.totalorder %s4375_s29, %s3572_s27  ;;  %p3580_p9 = scmp.lt.s32.totalorder %s4375_s29, %s4375_s29 }
  0x40   : > { %p3581_p10 = scmp.lt.s32.totalorder %s3572_s27, %s3572_s27 }
  0x41   : > { %p3575_p5 = pnand %p3573_p2, %p4381_p7 }
  0x42   : > { %p3582_p11 = por %p3581_p10, %p3580_p9 }
  0x43   : > { %p3576_p8 = pneg %p3575_p5 }
  0x44   : > { %3294 = dma.hbm_to_vmem [thread:$0]  (!%p4371_p6), %s5160_s25, 1024, %s682_s5, [#allocation6], %s5121_s9, %s5121_s9, %s5123_s10  }
  0x45   : > { %p3583_p12 = pnand %p3582_p11, %p3576_p8 }
  0x47   : > { %3586 = shalt.err (!%p3583_p12)
}
  0x48   : > { %s5161_s25 = sld [smem:[#allocation51_spill]]  ;;  %s3598_s5 = scalar_lea.vmem %s4377_s11, 256 }
  0x49   : > { %p3599_p13 = scmp.ne.s32.totalorder %s4377_s11, %s3598_s5  ;;  %p3606_p5 = scmp.lt.s32.totalorder %s4377_s11, %s4377_s11 }
  0x4a   : > { %p3607_p8 = scmp.lt.s32.totalorder %s3598_s5, %s3598_s5 }
  0x4b   : > { %p3601_p0 = pnand %p3599_p13, %p4381_p7 }
  0x4c   : > { %p3608_p9 = por %p3607_p8, %p3606_p5 }
  0x4d   : > { %p3602_p2 = pneg %p3601_p0 }
  0x4e   : > { %3300 = dma.hbm_to_vmem [thread:$0]  (!%p4371_p6), %s5161_s25, 256, %s4375_s29, [#allocation9], %s5121_s9, %s5121_s9, %s5123_s10  }
  0x4f   : > { %p3609_p10 = pnand %p3608_p9, %p3602_p2 }
  0x51   : > { %3612 = shalt.err (!%p3609_p10)
}
  0x52   : > { %s5162_s29 = sld [smem:[#allocation53_spill]]  ;;  %s4168_s3 = smov [#allocation14]  }
  0x53   : > { %s760_s26 = sshll.u32 %s4168_s3, 4  ;;  %s761_s26 = int_to_ptr.vmem [resolvable:$true] %s760_s26 }
  0x54   : > { %s3624_s25 = scalar_lea.vmem %s761_s26, 64  ;;  %p3632_p0 = scmp.lt.s32.totalorder %s761_s26, %s761_s26 }
  0x55   : > { %p3625_p11 = scmp.ne.s32.totalorder %s761_s26, %s3624_s25  ;;  %p3633_p2 = scmp.lt.s32.totalorder %s3624_s25, %s3624_s25 }
  0x57   : > { %p3627_p12 = pnand %p3625_p11, %p4381_p7  ;;  %p3634_p5 = por %p3633_p2, %p3632_p0 }
  0x58   : > { %3306 = dma.hbm_to_vmem [thread:$0]  (!%p4371_p6), %s5162_s29, 256, %s4377_s11, [#allocation12], %s5121_s9, %s5121_s9, %s5123_s10  }
  0x59   : > { %p3628_p13 = pneg %p3627_p12 }
  0x5b   : > { %p3635_p8 = pnand %p3634_p5, %p3628_p13 }
  0x5d   : > { %3638 = shalt.err (!%p3635_p8)
}
  0x5e   : > { %s5163_s27 = sld [smem:[#allocation55_spill]]  ;;  %s4169_s11 = smov [#allocation17]  }
  0x5f   : > { %s781_s6 = sshll.u32 %s4169_s11, 4  ;;  %s4170_s29 = smov [#allocation20]   ;;  %s782_s6 = int_to_ptr.vmem [resolvable:$true] %s781_s6 }
  0x60   : > { %s809_s3 = sshll.u32 %s4170_s29, 4  ;;  %s3650_s9 = scalar_lea.vmem %s782_s6, 256  ;;  %s810_s3 = int_to_ptr.vmem [resolvable:$true] %s809_s3 }
  0x61   : > { %p3651_p9 = scmp.ne.s32.totalorder %s782_s6, %s3650_s9  ;;  %p3658_p12 = scmp.lt.s32.totalorder %s782_s6, %s782_s6 }
  0x62   : > { %p3659_p13 = scmp.lt.s32.totalorder %s3650_s9, %s3650_s9 }
  0x63   : > { %p3653_p10 = pnand %p3651_p9, %p4381_p7 }
  0x64   : > { %3312 = dma.hbm_to_vmem [thread:$0]  (!%p4371_p6), %s5163_s27, 64, %s761_s26, [#allocation15]  }
  0x65   : > { %p3654_p11 = pneg %p3653_p10  ;;  %p3660_p0 = por %p3659_p13, %p3658_p12 }
  0x67   : > { %p3661_p2 = pnand %p3660_p0, %p3654_p11 }
  0x69   : > { %3664 = shalt.err (!%p3661_p2)
}
  0x6a   : > { %s5127_s25 = smov 64   ;;  %s5129_s21 = smov 4  }
  0x6b   : > { %s5164_s27 = sld [smem:[#allocation57_spill]]  ;;  %s3676_s11 = scalar_lea.vmem %s810_s3, 32 }
  0x6c   : > { %p3677_p5 = scmp.ne.s32.totalorder %s810_s3, %s3676_s11  ;;  %p3684_p10 = scmp.lt.s32.totalorder %s810_s3, %s810_s3 }
  0x6d   : > { %p3685_p11 = scmp.lt.s32.totalorder %s3676_s11, %s3676_s11 }
  0x6e   : > { %p3679_p8 = pnand %p3677_p5, %p4381_p7 }
  0x6f   : > { %p3686_p12 = por %p3685_p11, %p3684_p10 }
  0x70   : > { %p3680_p9 = pneg %p3679_p8 }
  0x71   : > { %3318 = dma.hbm_to_vmem [thread:$0]  (!%p4371_p6), %s5164_s27, 256, %s782_s6, [#allocation18], %s5127_s25, %s5127_s25, %s5129_s21  }
  0x72   : > { %p3687_p13 = pnand %p3686_p12, %p3680_p9 }
  0x74   : > { %3690 = shalt.err (!%p3687_p13)
}
  0x75   : > { %s5165_s13 = sld [smem:[#allocation59_spill]]  ;;  %s4173_s10 = smov [#allocation23]  }
  0x76   : > { %s833_s26 = sshll.u32 %s4173_s10, 4  ;;  %s4174_s6 = smov [#allocation26]   ;;  %s834_s26 = int_to_ptr.vmem [resolvable:$true] %s833_s26 }
  0x77   : > { %s857_s5 = sshll.u32 %s4174_s6, 4  ;;  %s3702_s27 = scalar_lea.vmem %s834_s26, 16  ;;  %s858_s5 = int_to_ptr.vmem [resolvable:$true] %s857_s5 }
  0x78   : > { %p3703_p0 = scmp.ne.s32.totalorder %s834_s26, %s3702_s27  ;;  %s3709_s11 = scalar_lea.vmem %s834_s26, 32 }
  0x79   : > { %p3710_p8 = scmp.lt.s32.totalorder %s834_s26, %s834_s26  ;;  %p3711_p9 = scmp.lt.s32.totalorder %s3709_s11, %s3702_s27 }
  0x7a   : > { %p3705_p2 = pnand %p3703_p0, %p4381_p7 }
  0x7b   : > { %3324 = dma.hbm_to_vmem [thread:$0]  (!%p4371_p6), %s5165_s13, 32, %s810_s3, [#allocation21]  }
  0x7c   : > { %p3706_p5 = pneg %p3705_p2  ;;  %p3712_p10 = por %p3711_p9, %p3710_p8 }
  0x7e   : > { %p3713_p11 = pnand %p3712_p10, %p3706_p5 }
  0x80   : > { %3716 = shalt.err (!%p3713_p11)
}
  0x81   : > { %s5166_s15 = sld [smem:[#allocation61_spill]]  ;;  %s3728_s10 = scalar_lea.vmem %s858_s5, 16 }
  0x82   : > { %p3729_p12 = scmp.ne.s32.totalorder %s858_s5, %s3728_s10  ;;  %s3735_s29 = scalar_lea.vmem %s858_s5, 32 }
  0x83   : > { %p3736_p0 = scmp.lt.s32.totalorder %s858_s5, %s858_s5  ;;  %p3737_p2 = scmp.lt.s32.totalorder %s3735_s29, %s3728_s10 }
  0x84   : > { %p3731_p13 = pnand %p3729_p12, %p4381_p7 }
  0x85   : > { %p3738_p1 = por %p3737_p2, %p3736_p0 }
  0x86   : > { %p3732_p4 = pneg %p3731_p13 }
  0x87   : > { %3330 = dma.hbm_to_vmem [thread:$0]  (!%p4371_p6), %s5166_s15, 16, %s834_s26, [#allocation24]  }
  0x88   : > { %p3739_p3 = pnand %p3738_p1, %p3732_p4 }
  0x8a   : > { %3742 = shalt.err (!%p3739_p3)
}
  0x8b   : > { %s5167_s17 = sld [smem:[#allocation63_spill]]  ;;  %s4175_s11 = smov [#allocation29]  }
  0x8c   : > { %s883_s26 = sshll.u32 %s4175_s11, 4  ;;  %s4176_s3 = smov [#allocation7]   ;;  %s884_s26 = int_to_ptr.vmem [resolvable:$true] %s883_s26 }
  0x8d   : > { %s694_s9 = sshll.u32 %s4176_s3, 4  ;;  %s3754_s25 = scalar_lea.vmem %s884_s26, 256  ;;  %s695_s9 = int_to_ptr.vmem [resolvable:$true] %s694_s9 }
  0x8e   : > { %p3755_p5 = scmp.ne.s32.totalorder %s884_s26, %s3754_s25  ;;  %p3762_p1 = scmp.lt.s32.totalorder %s884_s26, %s884_s26 }
  0x8f   : > { %p3763_p3 = scmp.lt.s32.totalorder %s3754_s25, %s3754_s25 }
  0x90   : > { %p3757_p8 = pnand %p3755_p5, %p4381_p7 }
  0x91   : > { %3336 = dma.hbm_to_vmem [thread:$0]  (!%p4371_p6), %s5167_s17, 16, %s858_s5, [#allocation27]  }
  0x92   : > { %p3758_p9 = pneg %p3757_p8  ;;  %p3764_p4 = por %p3763_p3, %p3762_p1 }
  0x94   : > { %p3765_p10 = pnand %p3764_p4, %p3758_p9 }
  0x96   : > { %3768 = shalt.err (!%p3765_p10)
}
  0x97   : > { %s5168_s5 = smov 64   ;;  %s5169_s20 = sld [smem:[#allocation65_spill]] }
  0x98   : > { %s3780_s6 = scalar_lea.vmem %s695_s9, 1024  ;;  %p3788_p0 = scmp.lt.s32.totalorder %s695_s9, %s695_s9 }
  0x99   : > { %p3781_p11 = scmp.ne.s32.totalorder %s695_s9, %s3780_s6  ;;  %p3789_p2 = scmp.lt.s32.totalorder %s3780_s6, %s3780_s6 }
  0x9b   : > { %p3783_p12 = pnand %p3781_p11, %p4381_p7  ;;  %p3790_p5 = por %p3789_p2, %p3788_p0 }
  0x9d   : > { %3342 = dma.hbm_to_vmem [thread:$0]  (!%p4371_p6), %s5169_s20, 256, %s884_s26, [#allocation30], %s5168_s5, %s5168_s5, %s5129_s21  }
  0x9e   : > { %p3784_p13 = pneg %p3783_p12 }
  0xa0   : > { %p3791_p8 = pnand %p3790_p5, %p3784_p13 }
  0xa2   : > { %3794 = shalt.err (!%p3791_p8)
}
  0xa3   : > { %s5170_s25 = smov 8   ;;  %s5171_s27 = smov 128  }
  0xa4   : > { %s5172_s10 = sld [smem:[#allocation50_spill]]  ;;  %s4177_s26 = smov [#allocation10]  }
  0xa5   : > { %s720_s29 = sshll.u32 %s4177_s26, 4  ;;  %s4178_s21 = smov [#allocation13]   ;;  %s721_s29 = int_to_ptr.vmem [resolvable:$true] %s720_s29 }
  0xa6   : > { %s746_s13 = sshll.u32 %s4178_s21, 4  ;;  %s3806_s6 = scalar_lea.vmem %s721_s29, 512  ;;  %s747_s13 = int_to_ptr.vmem [resolvable:$true] %s746_s13 }
  0xa7   : > { %p3807_p9 = scmp.ne.s32.totalorder %s721_s29, %s3806_s6  ;;  %p3814_p4 = scmp.lt.s32.totalorder %s721_s29, %s721_s29 }
  0xa8   : > { %p3815_p10 = scmp.lt.s32.totalorder %s3806_s6, %s3806_s6 }
  0xa9   : > { %p3809_p1 = pnand %p3807_p9, %p4381_p7 }
  0xaa   : > { %3297 = dma.hbm_to_vmem [thread:$0]  (!%p4371_p6), %s5172_s10, 1024, %s695_s9, [#allocation6], %s5171_s27, %s5171_s27, %s5170_s25  }
  0xab   : > { %p3810_p3 = pneg %p3809_p1  ;;  %p3816_p11 = por %p3815_p10, %p3814_p4 }
  0xad   : > { %p3817_p12 = pnand %p3816_p11, %p3810_p3 }
  0xaf   : > { %3820 = shalt.err (!%p3817_p12)
}
  0xb0   : > { %s5173_s11 = smov 4   ;;  %s5174_s21 = sld [smem:[#allocation52_spill]] }
  0xb1   : > { %s3832_s10 = scalar_lea.vmem %s747_s13, 512  ;;  %p3840_p5 = scmp.lt.s32.totalorder %s747_s13, %s747_s13 }
  0xb2   : > { %p3833_p13 = scmp.ne.s32.totalorder %s747_s13, %s3832_s10  ;;  %p3841_p8 = scmp.lt.s32.totalorder %s3832_s10, %s3832_s10 }
  0xb4   : > { %p3835_p0 = pnand %p3833_p13, %p4381_p7  ;;  %p3842_p9 = por %p3841_p8, %p3840_p5 }
  0xb6   : > { %3303 = dma.hbm_to_vmem [thread:$0]  (!%p4371_p6), %s5174_s21, 512, %s721_s29, [#allocation9], %s5168_s5, %s5168_s5, %s5173_s11  }
  0xb7   : > { %p3836_p2 = pneg %p3835_p0 }
  0xb9   : > { %p3843_p1 = pnand %p3842_p9, %p3836_p2 }
  0xbb   : > { %3846 = shalt.err (!%p3843_p1)
}
  0xbc   : > { %s5175_s9 = sld [smem:[#allocation54_spill]]  ;;  %s4179_s29 = smov [#allocation16]  }
  0xbd   : > { %s771_s3 = sshll.u32 %s4179_s29, 4  ;;  %s4180_s21 = smov [#allocation19]   ;;  %s772_s3 = int_to_ptr.vmem [resolvable:$true] %s771_s3 }
  0xbe   : > { %s795_s15 = sshll.u32 %s4180_s21, 4  ;;  %s3858_s10 = scalar_lea.vmem %s772_s3, 64  ;;  %s796_s15 = int_to_ptr.vmem [resolvable:$true] %s795_s15 }
  0xbf   : > { %p3859_p3 = scmp.ne.s32.totalorder %s772_s3, %s3858_s10  ;;  %p3866_p11 = scmp.lt.s32.totalorder %s772_s3, %s772_s3 }
  0xc0   : > { %p3867_p12 = scmp.lt.s32.totalorder %s3858_s10, %s3858_s10 }
  0xc1   : > { %p3861_p4 = pnand %p3859_p3, %p4381_p7 }
  0xc2   : > { %3309 = dma.hbm_to_vmem [thread:$0]  (!%p4371_p6), %s5175_s9, 512, %s747_s13, [#allocation12], %s5168_s5, %s5168_s5, %s5173_s11  }
  0xc3   : > { %p3862_p10 = pneg %p3861_p4  ;;  %p3868_p13 = por %p3867_p12, %p3866_p11 }
  0xc5   : > { %p3869_p0 = pnand %p3868_p13, %p3862_p10 }
  0xc7   : > { %3872 = shalt.err (!%p3869_p0)
}
  0xc8   : > { %s5176_s6 = sld [smem:[#allocation56_spill]]  ;;  %s3884_s9 = scalar_lea.vmem %s796_s15, 16 }
  0xc9   : > { %p3885_p2 = scmp.ne.s32.totalorder %s796_s15, %s3884_s9  ;;  %s3891_s29 = scalar_lea.vmem %s796_s15, 32 }
  0xca   : > { %p3892_p9 = scmp.lt.s32.totalorder %s796_s15, %s796_s15  ;;  %p3893_p1 = scmp.lt.s32.totalorder %s3891_s29, %s3884_s9 }
  0xcb   : > { %p3887_p5 = pnand %p3885_p2, %p4381_p7 }
  0xcc   : > { %p3894_p3 = por %p3893_p1, %p3892_p9 }
  0xcd   : > { %p3888_p8 = pneg %p3887_p5 }
  0xce   : > { %3315 = dma.hbm_to_vmem [thread:$0]  (!%p4371_p6), %s5176_s6, 64, %s772_s3, [#allocation15]  }
  0xcf   : > { %p3895_p4 = pnand %p3894_p3, %p3888_p8 }
  0xd1   : > { %3898 = shalt.err (!%p3895_p4)
}
  0xd2   : > { %s5177_s17 = sld [smem:[#allocation58_spill]]  ;;  %s4181_s26 = smov [#allocation22]  }
  0xd3   : > { %s819_s3 = sshll.u32 %s4181_s26, 4  ;;  %s4182_s13 = smov [#allocation25]   ;;  %s820_s3 = int_to_ptr.vmem [resolvable:$true] %s819_s3 }
  0xd4   : > { %s843_s6 = sshll.u32 %s4182_s13, 4  ;;  %s3910_s20 = scalar_lea.vmem %s820_s3, 256  ;;  %s844_s6 = int_to_ptr.vmem [resolvable:$true] %s843_s6 }
  0xd5   : > { %p3911_p10 = scmp.ne.s32.totalorder %s820_s3, %s3910_s20  ;;  %p3918_p13 = scmp.lt.s32.totalorder %s820_s3, %s820_s3 }
  0xd6   : > { %p3919_p0 = scmp.lt.s32.totalorder %s3910_s20, %s3910_s20 }
  0xd7   : > { %p3913_p11 = pnand %p3911_p10, %p4381_p7 }
  0xd8   : > { %3321 = dma.hbm_to_vmem [thread:$0]  (!%p4371_p6), %s5177_s17, 16, %s796_s15, [#allocation18]  }
  0xd9   : > { %p3914_p12 = pneg %p3913_p11  ;;  %p3920_p2 = por %p3919_p0, %p3918_p13 }
  0xdb   : > { %p3921_p5 = pnand %p3920_p2, %p3914_p12 }
  0xdd   : > { %3924 = shalt.err (!%p3921_p5)
}
  0xde   : > { %s5178_s14 = sld [smem:[#allocation60_spill]]  ;;  %s3936_s9 = scalar_lea.vmem %s844_s6, 256 }
  0xdf   : > { %p3937_p8 = scmp.ne.s32.totalorder %s844_s6, %s3936_s9  ;;  %p3944_p3 = scmp.lt.s32.totalorder %s844_s6, %s844_s6 }
  0xe0   : > { %p3945_p4 = scmp.lt.s32.totalorder %s3936_s9, %s3936_s9 }
  0xe1   : > { %p3939_p9 = pnand %p3937_p8, %p4381_p7 }
  0xe2   : > { %p3946_p10 = por %p3945_p4, %p3944_p3 }
  0xe3   : > { %p3940_p1 = pneg %p3939_p9 }
  0xe4   : > { %3327 = dma.hbm_to_vmem [thread:$0]  (!%p4371_p6), %s5178_s14, 256, %s820_s3, [#allocation21], %s5168_s5, %s5168_s5, %s5173_s11  }
  0xe5   : > { %p3947_p11 = pnand %p3946_p10, %p3940_p1 }
  0xe7   : > { %3950 = shalt.err (!%p3947_p11)
}
  0xe8   : > { %s5179_s16 = sld [smem:[#allocation62_spill]]  ;;  %s4183_s21 = smov [#allocation28]  }
  0xe9   : > { %s867_s10 = sshll.u32 %s4183_s21, 4  ;;  %s4184_s26 = smov [#allocation31]   ;;  %s868_s10 = int_to_ptr.vmem [resolvable:$true] %s867_s10 }
  0xea   : > { %s899_s3 = sshll.u32 %s4184_s26, 4  ;;  %s3962_s13 = scalar_lea.vmem %s868_s10, 256  ;;  %s900_s3 = int_to_ptr.vmem [resolvable:$true] %s899_s3 }
  0xeb   : > { %p3963_p12 = scmp.ne.s32.totalorder %s868_s10, %s3962_s13  ;;  %p3970_p2 = scmp.lt.s32.totalorder %s868_s10, %s868_s10 }
  0xec   : > { %p3971_p5 = scmp.lt.s32.totalorder %s3962_s13, %s3962_s13 }
  0xed   : > { %p3965_p13 = pnand %p3963_p12, %p4381_p7 }
  0xee   : > { %3333 = dma.hbm_to_vmem [thread:$0]  (!%p4371_p6), %s5179_s16, 256, %s844_s6, [#allocation24], %s5168_s5, %s5168_s5, %s5173_s11  }
  0xef   : > { %p3966_p0 = pneg %p3965_p13  ;;  %p3972_p8 = por %p3971_p5, %p3970_p2 }
  0xf1   : > { %p3973_p9 = pnand %p3972_p8, %p3966_p0 }
  0xf3   : > { %3976 = shalt.err (!%p3973_p9)
}
  0xf4   : > { %s5180_s18 = sld [smem:[#allocation64_spill]]  ;;  %s3988_s17 = scalar_lea.vmem %s900_s3, 256 }
  0xf5   : > { %p3989_p1 = scmp.ne.s32.totalorder %s900_s3, %s3988_s17  ;;  %p3996_p10 = scmp.lt.s32.totalorder %s900_s3, %s900_s3 }
  0xf6   : > { %p3997_p11 = scmp.lt.s32.totalorder %s3988_s17, %s3988_s17 }
  0xf7   : > { %p3991_p3 = pnand %p3989_p1, %p4381_p7 }
  0xf8   : > { %p3998_p12 = por %p3997_p11, %p3996_p10 }
  0xf9   : > { %p3992_p4 = pneg %p3991_p3 }
  0xfa   : > { %3339 = dma.hbm_to_vmem [thread:$0]  (!%p4371_p6), %s5180_s18, 256, %s868_s10, [#allocation27], %s5168_s5, %s5168_s5, %s5173_s11  }
  0xfb   : > { %p3999_p13 = pnand %p3998_p12, %p3992_p4 }
  0xfd   : > { %4002 = shalt.err (!%p3999_p13)
}
  0xfe   : > { %s5181_s22 = sld [smem:[#allocation67_spill]]  ;;  %s2862_s1 = sadd.s32 4294967294, %s4161_s30  }
  0xff   : > { %s4559_s2 = sadd.s32 1, %s4161_s30   ;;  %s89_s21 = sadd.s32 1, %s4157_s8 }
 0x100   : > { %s86_s29 = ssub.s32 %s4161_s30, %s4559_s2  ;;  %p96_p0 = scmp.ne.s32.totalorder %s4157_s8, %s4153_s4 }
 0x101   : > { %p87_p7 = scmp.eq.s32.totalorder %s86_s29, 0  ;;  %p97_p2 = scmp.eq.s32.totalorder %s4161_s30, 0 }
 0x102   : > { %p102_p5 = scmp.ne.s32.totalorder %s4153_s4, %s4149_s7  ;;  %p5183_p9 = scmp.eq.s32.totalorder %s4357_s28, 0 }
 0x103   : > { %s4570_s10 = scalar_select %p87_p7, %s4157_s8, %s89_s21  }
 0x104   : > { %3345 = dma.hbm_to_vmem [thread:$0]  (!%p4371_p6), %s5181_s22, 256, %s900_s3, [#allocation30], %s5168_s5, %s5168_s5, %s5173_s11  }
 0x105   : > { %p4572_p8 = por %p97_p2, %p96_p0  ;;  %p4578_p6 = por %p5183_p9, %p102_p5 }
 0x106   : > { %p630_p1 = scmp.eq.s32.totalorder %s4357_s28, 1  ;;  %p636_p3 = scmp.eq.s32.totalorder %s2862_s1, 1 }
 0x107   : > { %s5184_s5 = scalar_select %p4578_p6, 1, 0 }
 0x108   : > { %p3375_p4 = scmp.lt.s32.totalorder %s4161_s30, 2  ;;  %s931_s11 = sand.u32 1, %s4157_s8  }
 0x109   : > { %p4585_p10 = por %p630_p1, %p96_p0  ;;  %p4589_p11 = por %p636_p3, %p102_p5 }
 0x10a   : > { %s2883_s6 = sshll.u32 %s931_s11, 4  ;;  %s2974_s15 = sshll.u32 %s4161_s30, 8 }
 0x10b   : > { %s5185_s3 = scalar_select %p4585_p10, 1, 0 }
 0x10c   : > { %s5186_s13 = scalar_select %p4589_p11, 1, 0 }
 0x10d   : > { %s5187_s20 = sld [smem:[#allocation48_spill]]  ;;  %s935_s1 = scalar_lea.vmem [#allocation2], %s2883_s6 }
 0x10e   : > { %s942_s21 = sshll.u32 %s935_s1, 4  ;;  %p4603_p12 = pnand %p3375_p4, %p4572_p8  ;;  %s4599_s21 = int_to_ptr.vmem [resolvable:$true] %s942_s21 }
 0x10f   : > { %s4607_s16 = scalar_lea.sflag [#allocation3], %s931_s11 }
 0x110   : > { %p4005_p7 = pneg %p4603_p12 }
 0x113   : > { %s4597_s29 = scalar_lea.hbm %s5187_s20, %s2974_s15  ;;  %s4008_s6 = scalar_lea.hbm %s5187_s20, 512 }
 0x114   : > { %s4003_s18 = scalar_lea.hbm %s4597_s29, 256  ;;  %p4009_p5 = scmp.lt.s32.totalorder %s4597_s29, %s5187_s20 }
 0x115   : > { %p4004_p13 = scmp.ne.s32.totalorder %s4597_s29, %s4003_s18  ;;  %p4010_p8 = scmp.lt.s32.totalorder %s4008_s6, %s4003_s18 }
 0x117   : > { %p4006_p0 = pnand %p4005_p7, %p4004_p13  ;;  %p4011_p9 = por %p4010_p8, %p4009_p5 }
 0x119   : > { %p4007_p2 = pneg %p4006_p0 }
 0x11b   : > { %p4012_p1 = pnand %p4011_p9, %p4007_p2 }
 0x11d   : > { %4015 = shalt.err (!%p4012_p1)
}
 0x11e   : > { %s4016_s26 = scalar_lea.vmem %s4599_s21, 256  ;;  %s4185_s11 = smov [#allocation2]  }
 0x11f   : > { %p4017_p3 = scmp.ne.s32.totalorder %s4599_s21, %s4016_s26  ;;  %s4021_s22 = sshll.u32 %s4185_s11, 4  ;;  %s4022_s22 = int_to_ptr.vmem [resolvable:$false] %s4021_s22 }
 0x120   : > { %s4023_s15 = scalar_lea.vmem %s4022_s22, 512  ;;  %p4024_p0 = scmp.lt.s32.totalorder %s4599_s21, %s4022_s22 }
 0x121   : > { %p4019_p4 = pnand %p4017_p3, %p4005_p7  ;;  %p4025_p11 = scmp.lt.s32.totalorder %s4023_s15, %s4016_s26 }
 0x123   : > { %p4020_p13 = pneg %p4019_p4  ;;  %p4026_p10 = por %p4025_p11, %p4024_p0 }
 0x125   : > { %p4027_p6 = pnand %p4026_p10, %p4020_p13 }
 0x127   : > { %4030 = shalt.err (!%p4027_p6)
}
 0x128   : > { %3349 = dma.hbm_to_vmem [thread:$0]  (!%p4603_p12), %s4597_s29, 256, %s4599_s21, %s4607_s16, %s5171_s27, %s5171_s27, %s5170_s25  }
 0x129   : > { %p5189_p7 = scmp.ne.s32.totalorder %s5157_s0, 0 }
 0x12a   : > { %s4634_s18 = sand.u32 (!%p5189_p7), 1, %s4153_s4   ;;  %p5190_p6 = scmp.ne.s32.totalorder (!%p5189_p7), %s5184_s5, 0 }
 0x12b   : > { %954 = sbr.rel (%p5189_p7) target bundleno = 4203 (0x106b), region = 124  ;;  %s4637_s22 = sshll.u32 (!%p5189_p7), %s4634_s18, 4 }
 0x12c   : > { %s957_s14 = scalar_lea.sflag (!%p5189_p7), [#allocation3], %s4634_s18  ;;  %s960_s17 = scalar_lea.vmem (!%p5189_p7), [#allocation2], %s4637_s22 }
 0x130   : > { %4100 = dma.done.wait (%p5190_p6), %s957_s14, 256  }
 0x131   : > { %4102 = vsyncadd (%p5190_p6), %s957_s14, 4294967040  ;;  %p5191_p10 = scmp.eq.s32.totalorder %s4357_s28, 0 }
 0x133   : > { %4104 = dma.done.wait (%p5191_p10), [#allocation6], 2048   ;;  %p5192_p11 = pmov %p5191_p10 }
 0x134   : > { %p5193_p12 = pmov %p5191_p10 }
 0x135   : > { %4106 = vsyncadd (%p5192_p11), [#allocation6], 4294965248 }
 0x136   : > { %4108 = dma.done.wait (%p5193_p12), [#allocation9], 768   ;;  %p5194_p2 = pmov %p5191_p10 }
 0x138   : > { %4110 = vsyncadd (%p5194_p2), [#allocation9], 4294966528  ;;  %p5195_p5 = pmov %p5194_p2 }
 0x139   : > { %p5196_p8 = pmov %p5194_p2 }
 0x13a   : > { %4112 = dma.done.wait (%p5195_p5), [#allocation12], 768  }
 0x13b   : > { %4114 = vsyncadd (%p5196_p8), [#allocation12], 4294966528  ;;  %p5197_p9 = pmov %p5194_p2 }
 0x13c   : > { %p5198_p1 = pmov %p5194_p2 }
 0x13d   : > { %4116 = dma.done.wait (%p5197_p9), [#allocation15], 128  }
 0x13e   : > { %4118 = vsyncadd (%p5198_p1), [#allocation15], 4294967168  ;;  %p5199_p3 = pmov %p5198_p1 }
 0x13f   : > { %p5200_p4 = pmov %p5198_p1 }
 0x140   : > { %4120 = dma.done.wait (%p5199_p3), [#allocation18], 272  }
 0x141   : > { %4122 = vsyncadd (%p5200_p4), [#allocation18], 4294967024  ;;  %p5201_p13 = pmov %p5198_p1 }
 0x142   : > { %p5202_p0 = pmov %p5198_p1 }
 0x143   : > { %4124 = dma.done.wait (%p5201_p13), [#allocation21], 288  }
 0x144   : > { %4126 = vsyncadd (%p5202_p0), [#allocation21], 4294967008  ;;  %p5203_p7 = pmov %p5202_p0 }
 0x145   : > { %p5204_p6 = pmov %p5202_p0 }
 0x146   : > { %4128 = dma.done.wait (%p5203_p7), [#allocation24], 272  }
 0x147   : > { %4130 = vsyncadd (%p5204_p6), [#allocation24], 4294967024  ;;  %p5205_p10 = pmov %p5202_p0 }
 0x148   : > { %p5206_p11 = pmov %p5202_p0 }
 0x149   : > { %4132 = dma.done.wait (%p5205_p10), [#allocation27], 272  }
 0x14a   : > { %4134 = vsyncadd (%p5206_p11), [#allocation27], 4294967024  ;;  %p5207_p12 = pmov %p5202_p0 }
 0x14b   : > { %p5208_p2 = pmov %p5202_p0 }
 0x14c   : > { %4136 = dma.done.wait (%p5207_p12), [#allocation30], 512  }
 0x14d   : > { %4138 = vsyncadd (%p5208_p2), [#allocation30], 4294966784  ;;  %s2908_s16 = sshll.u32 %s4357_s28, 1  ;;  %vm1188_vm0 = vcmask 261120   ;;  %s5209_s5 = sld [smem:[#allocation47_spill]]  ;;  %v4186_v7 = vmov 0   ;;  %v1158_v25 = vlaneseq }
 0x14e   : > { %p1114_p5 = scmp.lt.s32.totalorder %s2908_s16, 3  ;;  %v3457_v4 = vld [vmem:[%s5102_s12 + $0x14] ss:$8 sps:$4 sm:$0xff]   ;;  %v3459_v5 = vld [vmem:[%s5102_s12 + $0x10] ss:$8 sps:$4 sm:$0xff]   ;;  %1224 = vmatprep.mubr.bf16.mxu0 %v4186_v7  ;;  %v4187_v23 = vmov 0.0  }
 0x14f   : > { %v3460_v6 = vld [vmem:[%s5102_s12 + $0x4] ss:$8 sps:$4 sm:$0xff]   ;;  %1204 = vmatprep.subr.bf16.mxu0 %v3457_v4  ;;  %v3462_v8 = vld [vmem:[%s5102_s12] ss:$8 sps:$4 sm:$0xff]   ;;  %v3463_v22 = vld [vmem:[#allocation17 + $0x8] sm:$0xff]   ;;  %3045 = vmatprep.subr.bf16.mxu1 %v4187_v23  ;;  %vm4188_vm1 = vmmov 0  }
 0x150   : > { %s5222_s16 = smov (!%p1114_p5, %s2908_s16), 3  ;;  %1205 = vmatpush1.bf16.msra.mxu0 %v3459_v5  ;;  %v1126_v9 = vld [vmem:[%s960_s17] sm:$0xff]  ;;  %v2911_v10 = vld [vmem:[%s960_s17 + $0x8] sm:$0xff]  ;;  %3049 = vmatprep.mubr.msk.bf16.mxu1 %vm4188_vm1, %v4187_v23  ;;  %v4722_v26 = vshrl.u32 %v1158_v25, 7  ;;  %vm1433_vm6 = vcmask 523264   ;;  %s4189_s17 = smov 96  }
 0x151   : > { %s2909_s0 = sshll.u32 %s5222_s16, 3  ;;  %1206 = vmatprep.subr.bf16.mxu0 %v3460_v6  ;;  %v1155_v11 = vpack.c.bf16 %v2911_v10, %v1126_v9  ;;  %3046 = vmatpush3.bf16.msra.mxu1 %v3463_v22  ;;  %v3464_v24 = vld [vmem:[#allocation17] sm:$0xff]   ;;  %v1156_v27 = vld [vmem:[#allocation20] sm:$0x3]  ;;  %v1241_v34 = vld [vmem:[#allocation5 + $0x30] sm:$0xff]  ;;  %s4190_s16 = smov 64  }
 0x152   : > { %3047 = vmatprep.subr.bf16.mxu1 %v4187_v23  ;;  %v4725_v28 = vsub.s32 0, %v4722_v26  ;;  %v4728_v29 = vsub.s32 1, %v4722_v26  ;;  %v1242_v38 = vld [vmem:[#allocation5 + $0x38] sm:$0xff]  ;;  %v1239_v41 = vld [vmem:[#allocation5 + $0x20] sm:$0xff]  ;;  %v1240_v42 = vld [vmem:[#allocation5 + $0x28] sm:$0xff]  ;;  %s1112_s25 = scalar_lea.vmem [#allocation33], %s4637_s22 }
 0x153   : > { %s1117_s29 = scalar_lea.vmem %s5209_s5, %s2909_s0  ;;  %v1237_v52 = vld [vmem:[#allocation5 + $0x10] sm:$0xff]  ;;  %v1238_v53 = vld [vmem:[#allocation5 + $0x18] sm:$0xff]  ;;  %v1235_v58 = vld [vmem:[#allocation5] sm:$0xff]  ;;  %s4191_s0 = smov 32  }
 0x154   : > { %v1123_v0 = vld [vmem:[%s1117_s29] sm:$0xff]  ;;  %v2910_v1 = vld [vmem:[%s1117_s29 + $0x8] sm:$0xff]  ;;  %1207 = vmatpush1.bf16.msra.mxu0 %v3462_v8  ;;  %v1161_v30 = vrot.slane %v1156_v27, %v4725_v28  ;;  %v1165_v32 = vrot.slane %v1156_v27, %v4728_v29  ;;  %s2574_s27 = sshll.u32 %s1112_s25, 4  ;;  %s2975_s5 = sshll.u32 %s4357_s28, 8  ;;  %s4995_s27 = int_to_ptr.vmem [resolvable:$true] %s2574_s27 }
 0x155   : > { %v1251_v2 = vsel %vm1188_vm0, %v1123_v0, 0.0  ;;  %v1254_v3 = vsel %vm1188_vm0, %v2910_v1, 0.0  ;;  %3053 = vmatprep.subr.bf16.mxu0 %v4187_v23  ;;  %3048 = vmatpush3.bf16.msra.mxu1 %v3464_v24  ;;  %v1236_v59 = vld [vmem:[#allocation5 + $0x8] sm:$0xff]  ;;  %v4762_v22 = vld [vmem:[#allocation16] sm:$0x7]  ;;  %s5211_s6 = sld [smem:[#allocation70_spill]] }
 0x156   : > { %1252 = vadd.xlane.f32.xlu0 %v1251_v2  ;;  %3065 = vmatprep.subr.bf16.mxu1 %v4187_v23  ;;  %s2545_s1 = scalar_lea.sflag [#allocation34], %s4634_s18  ;;  %s4031_s26 = scalar_lea.vmem %s4995_s27, 256 }
 0x157   : > { %2916 = vmatmul.mubr.msk.bf16.vlgmr.msra.gmra.mxu0 %vm1188_vm0, %v1155_v11  ;;  %p4032_p8 = scmp.ne.s32.totalorder %s4995_s27, %s4031_s26  ;;  %p5212_p9 = scmp.ne.s32.totalorder %s5185_s3, 0 }
 0x158   : > { %3061 = vmatprep.mubr.msk.bf16.mxu0 %vm4188_vm1, %v4187_v23  ;;  %s4192_s11 = smov [#allocation33]  }
 0x159   : > { %p4033_p1 = pnand %p4032_p8, %p5212_p9  ;;  %s4035_s15 = sshll.u32 %s4192_s11, 4  ;;  %s4036_s15 = int_to_ptr.vmem [resolvable:$false] %s4035_s15 }
 0x15a   : > { %1255 = vadd.xlane.f32.xlu0 %v1254_v3  ;;  %s4037_s14 = scalar_lea.vmem %s4036_s15, 512  ;;  %p4038_p4 = scmp.lt.s32.totalorder %s4995_s27, %s4036_s15 }
 0x15b   : > { %s5002_s9 = scalar_lea.hbm %s5211_s6, %s2975_s5  ;;  %p4034_p3 = pneg %p4033_p1 }
 0x15c   : > { %p4039_p13 = scmp.lt.s32.totalorder %s4037_s14, %s4031_s26 }
 0x15e   : > { %p4040_p0 = por %p4039_p13, %p4038_p4 }
 0x160   : > { %p4041_p7 = pnand %p4040_p0, %p4034_p3 }
 0x1df   : > { %v1253_v12 = vpop.xlane.xlu0 %1252 }
 0x1e0   : > { %v1258_v13 = vmul.f32 0.03125, %v1253_v12 }
 0x1e2   : > { %v4704_v14 = vsub.f32 %v1123_v0, %v1258_v13 }
 0x1e3   : > { %v1256_v15 = vpop.xlane.xlu0 %1255 }
 0x1e4   : > { %v1259_v16 = vmul.f32 0.03125, %v1256_v15  ;;  %v1262_v17 = vmul.f32 %v4704_v14, %v4704_v14 }
 0x1e6   : > { %v4708_v18 = vsub.f32 %v2910_v1, %v1259_v16  ;;  %v1264_v19 = vsel %vm1188_vm0, %v1262_v17, 0.0 }
 0x1e7   : > { %1265 = vadd.xlane.f32.xlu1 %v1264_v19  ;;  %v4758_v19 = vld [vmem:[#allocation14] sm:$0x7] }
 0x1e8   : > { %v1263_v20 = vmul.f32 %v4708_v18, %v4708_v18 }
 0x1ea   : > { %v1267_v21 = vsel %vm1188_vm0, %v1263_v20, 0.0  ;;  %v1293_v20 = vrot.slane %v4758_v19, %v4725_v28 }
 0x1eb   : > { %1268 = vadd.xlane.f32.xlu1 %v1267_v21 }
 0x1ec   : > { %v1294_v24 = vmul.f32 %v1293_v20, %v4704_v14  ;;  %v1295_v25 = vmul.f32 %v1293_v20, %v4708_v18 }
 0x217   : > { %v1226_v31 = vpop.f32.mrf.mxu0 }
 0x218   : > { %v1227_v33 = vadd.f32 %v1226_v31, %v1161_v30 }
 0x219   : > { %v1228_v35 = vpop.f32.mrf.mxu0 }
 0x21a   : > { %v4732_v36 = vadd.f32 %v1228_v35, %v1165_v32  ;;  %v1249_v39 = vmul.f32 %v1241_v34, %v1227_v33  ;;  %v1247_v46 = vmul.f32 %v1239_v41, %v1227_v33  ;;  %v1245_v54 = vmul.f32 %v1237_v52, %v1227_v33  ;;  %v4776_v52 = vld [vmem:[#allocation10 + $0x18] sm:$0xff]  }
 0x21b   : > { %v1230_v37 = vpop.f32.mrf.mxu0  ;;  %v1243_v60 = vmul.f32 %v1235_v58, %v1227_v33 }
 0x21c   : > { %v1231_v40 = vadd.f32 %v1230_v37, %v1161_v30  ;;  %v1301_v30 = vrot.slane %v4762_v22, %v4725_v28 }
 0x21d   : > { %v1232_v43 = vpop.f32.mrf.mxu0 }
 0x21e   : > { %v1250_v44 = vmul.f32 %v1242_v38, %v1231_v40  ;;  %v4734_v45 = vadd.f32 %v1232_v43, %v1165_v32  ;;  %v1248_v47 = vmul.f32 %v1240_v42, %v1231_v40  ;;  %v1246_v55 = vmul.f32 %v1238_v53, %v1231_v40  ;;  %v2917_v38 = vld [vmem:[#allocation19] ss:$0 sm:$0xff]  ;;  %v4780_v53 = vld [vmem:[#allocation10 + $0x10] sm:$0xff]  }
 0x21f   : > { %v1244_v61 = vmul.f32 %v1236_v59, %v1231_v40 }
 0x220   : > { %v4736_v48 = vpack.c.bf16 %v1250_v44, %v1249_v39  ;;  %v2044_v49 = vpack.c.bf16 %v4734_v45, %v4732_v36  ;;  %v4742_v51 = vpack.c.bf16 %v1248_v47, %v1247_v46  ;;  %v4747_v57 = vpack.c.bf16 %v1246_v55, %v1245_v54  ;;  %v4788_v54 = vld [vmem:[#allocation10 + $0x8] sm:$0xff]   ;;  %v4793_v55 = vld [vmem:[#allocation10] sm:$0xff]  }
 0x221   : > { %v4752_v63 = vpack.c.bf16 %v1244_v61, %v1243_v60 }
 0x222   : > { %v1390_v50 = vsel %vm1188_vm0, %v4736_v48, 0  ;;  %v1387_v56 = vsel %vm1188_vm0, %v4742_v51, 0  ;;  %v1384_v62 = vsel %vm1188_vm0, %v4747_v57, 0 }
 0x223   : > { %3054 = vmatpush3.bf16.xpose.msra.mxu0 %v1390_v50  ;;  %v1381_v0 = vsel %vm1188_vm0, %v4752_v63, 0 }
 0x224   : > { %3055 = vmatprep.subr.bf16.mxu0 %v4187_v23 }
 0x22b   : > { %3056 = vmatpush3.bf16.xpose.msra.mxu0 %v1387_v56 }
 0x22c   : > { %3057 = vmatprep.subr.bf16.mxu0 %v4187_v23 }
 0x233   : > { %3058 = vmatpush3.bf16.xpose.msra.mxu0 %v1384_v62 }
 0x234   : > { %3059 = vmatprep.subr.bf16.mxu0 %v4187_v23 }
 0x23b   : > { %3060 = vmatpush3.bf16.xpose.msra.mxu0 %v1381_v0 }
 0x23c   : > { %3089 = vmatprep.subr.bf16.mxu0 %v4187_v23 }
 0x270   : > { %v1266_v1 = vpop.xlane.xlu1 %1265 }
 0x271   : > { %v1270_v2 = vmul.f32 0.032258064, %v1266_v1 }
 0x273   : > { %3487 = vrsqrt.f32 %v1270_v2  ;;  %vm1274_vm2 = vcmp.eq.f32.partialorder %v1270_v2, inf  ;;  %v1277_v7 = vand.u32 2147483648, %v1270_v2  ;;  %vm1276_vm3 = vcmp.eq.f32.partialorder %v1270_v2, 0.0 }
 0x274   : > { %v1269_v3 = vpop.xlane.xlu1 %1268 }
 0x275   : > { %v1271_v4 = vmul.f32 0.032258064, %v1269_v3 }
 0x277   : > { %3489 = vrsqrt.f32 %v1271_v4  ;;  %vm1281_vm4 = vcmp.eq.f32.partialorder %v1271_v4, inf  ;;  %v1284_v13 = vand.u32 2147483648, %v1271_v4  ;;  %vm1283_vm5 = vcmp.eq.f32.partialorder %v1271_v4, 0.0 }
 0x280   : > { %v3488_v5 = vpop.eup %3487 }
 0x281   : > { %v1273_v6 = vmul.f32 %v3488_v5, %v1270_v2 }
 0x283   : > { %v1275_v8 = vsel %vm1274_vm2, %v1270_v2, %v1273_v6 }
 0x284   : > { %v3490_v9 = vpop.eup %3489  ;;  %v1278_v10 = vsel %vm1276_vm3, %v1277_v7, %v1275_v8  ;;  %v3469_v7 = vld [vmem:[#allocation25 + $0x8] sm:$0xff]  }
 0x285   : > { %v1286_v11 = vadd.f32 1e-06, %v1278_v10  ;;  %v1280_v12 = vmul.f32 %v3490_v9, %v1271_v4 }
 0x287   : > { %3491 = vrcp.f32 %v1286_v11  ;;  %v1282_v15 = vsel %vm1281_vm4, %v1271_v4, %v1280_v12 }
 0x288   : > { %v1285_v16 = vsel %vm1283_vm5, %v1284_v13, %v1282_v15 }
 0x289   : > { %v1287_v17 = vadd.f32 1e-06, %v1285_v16  ;;  %v4808_v16 = vld [vmem:[#allocation8] sm:$0xff] }
 0x28b   : > { %3493 = vrcp.f32 %v1287_v17  ;;  %v4810_v17 = vld [vmem:[#allocation8 + $0x8] sm:$0xff] }
 0x294   : > { %v3492_v21 = vpop.eup %3491 }
 0x295   : > { %v1296_v27 = vmul.f32 %v3492_v21, %v1294_v24 }
 0x297   : > { %v1302_v33 = vadd.f32 %v1301_v30, %v1296_v27  ;;  %v3470_v27 = vld [vmem:[#allocation25] sm:$0xff]  }
 0x298   : > { %v3494_v31 = vpop.eup %3493 }
 0x299   : > { %v1297_v32 = vmul.f32 %v3494_v31, %v1295_v25 }
 0x29b   : > { %v1303_v34 = vadd.f32 %v1301_v30, %v1297_v32 }
 0x29d   : > { %v1308_v35 = vpack.c.bf16 %v1303_v34, %v1302_v33 }
 0x29f   : > { %3050 = vmatmul.mubr.msk.bf16.vlgmr.msra.gmra.mxu1 %vm1188_vm0, %v1308_v35  ;;  %v2928_v35 = vld [vmem:[#allocation26] ss:$0 sm:$0xff] }
 0x2a0   : > { %3073 = vmatprep.mubr.msk.bf16.mxu1 %vm4188_vm1, %v4187_v23  ;;  %3066 = vmatpush3.bf16.msra.mxu1 %v4776_v52 }
 0x2a1   : > { %3067 = vmatprep.subr.bf16.mxu1 %v4187_v23 }
 0x2a4   : > { %3068 = vmatpush3.bf16.msra.mxu1 %v4780_v53 }
 0x2a5   : > { %3069 = vmatprep.subr.bf16.mxu1 %v4187_v23 }
 0x2a8   : > { %3070 = vmatpush3.bf16.msra.mxu1 %v4788_v54 }
 0x2a9   : > { %3071 = vmatprep.subr.bf16.mxu1 %v4187_v23 }
 0x2ac   : > { %3072 = vmatpush3.bf16.msra.mxu1 %v4793_v55 }
 0x2ad   : > { %3077 = vmatprep.subr.bf16.mxu1 %v4187_v23 }
 0x35f   : > { %v1365_v37 = vpop.f32.mrf.mxu1 }
 0x360   : > { %v1366_v40 = vadd.f32 %v2917_v38, %v1365_v37 }
 0x361   : > { %v3051_v39 = vpop.f32.mrf.mxu1 }
 0x363   : > { %v1368_v14 = vpop.f32.mrf.mxu1 }
 0x364   : > { %v1369_v18 = vadd.f32 %v2917_v38, %v1368_v14 }
 0x365   : > { %v3052_v41 = vpop.f32.mrf.mxu1 }
 0x366   : > { %v1372_v42 = vpack.c.bf16 %v1369_v18, %v1366_v40 }
 0x368   : > { %3062 = vmatmul.mubr.msk.bf16.vlgmr.msra.gmra.mxu0 %vm1188_vm0, %v1372_v42 }
 0x369   : > { %3093 = vmatprep.mubr.msk.bf16.mxu0 %vm4188_vm1, %v4187_v23  ;;  %3090 = vmatpush3.bf16.msra.mxu0 %v3469_v7 }
 0x36a   : > { %3091 = vmatprep.subr.bf16.mxu0 %v4187_v23 }
 0x36d   : > { %3092 = vmatpush3.bf16.msra.mxu0 %v3470_v27 }
 0x36e   : > { %3105 = vmatprep.subr.bf16.mxu0 %v4187_v23 }
 0x428   : > { %v1426_v28 = vpop.f32.mrf.mxu0 }
 0x429   : > { %v1434_v43 = vsel %vm1433_vm6, %v1426_v28, -inf }
 0x42a   : > { %1435 = vmax.xlane.f32.xlu0 %v1434_v43  ;;  %v3063_v44 = vpop.f32.mrf.mxu0 }
 0x42c   : > { %v1429_v46 = vpop.f32.mrf.mxu0 }
 0x42d   : > { %v1437_v47 = vsel %vm1433_vm6, %v1429_v46, -inf }
 0x42e   : > { %1438 = vmax.xlane.f32.xlu1 %v1437_v47  ;;  %v3064_v50 = vpop.f32.mrf.mxu0 }
 0x43f   : > { %1530 = vrot.lane.b32.xlu1 %v4742_v51, %s4189_s17 }
 0x440   : > { %1532 = vrot.lane.b32.xlu0 %v4736_v48, %s4189_s17 }
 0x443   : > { %1528 = vrot.lane.b32.xlu1 %v4747_v57, %s4189_s17 }
 0x447   : > { %1526 = vrot.lane.b32.xlu1 %v4752_v63, %s4189_s17 }
 0x4b3   : > { %v1436_v56 = vpop.xlane.xlu0 %1435 }
 0x4b4   : > { %v1440_v58 = vsub.f32 %v1426_v28, %v1436_v56 }
 0x4b6   : > { %v1442_v59 = vmul.f32 1.442695, %v1440_v58 }
 0x4b7   : > { %v1439_v60 = vpop.xlane.xlu1 %1438  ;;  %v1533_v3 = vpop.permute.xlu0 %1532 }
 0x4b8   : > { %v1441_v61 = vsub.f32 %v1429_v46, %v1439_v60  ;;  %3495 = vpow2.f32 %v1442_v59 }
 0x4ba   : > { %v1444_v62 = vmul.f32 1.442695, %v1441_v61 }
 0x4bb   : > { %v1531_v4 = vpop.permute.xlu1 %1530 }
 0x4bc   : > { %3497 = vpow2.f32 %v1444_v62 }
 0x4bf   : > { %v1529_v5 = vpop.permute.xlu1 %1528 }
 0x4c3   : > { %v1527_v6 = vpop.permute.xlu1 %1526 }
 0x4c5   : > { %v3496_v0 = vpop.eup %3495 }
 0x4c9   : > { %v3498_v1 = vpop.eup %3497 }
 0x4ca   : > { %v1446_v2 = vpack.c.bf16 %v3498_v1, %v3496_v0 }
 0x4cc   : > { %3074 = vmatmul.mubr.msk.bf16.vlgmr.msra.gmra.mxu1 %vm1433_vm6, %v1446_v2 }
 0x4cd   : > { %3078 = vmatpush3.bf16.msra.mxu1 %v1533_v3  ;;  %3085 = vmatprep.mubr.msk.bf16.mxu1 %vm4188_vm1, %v4187_v23 }
 0x4ce   : > { %3079 = vmatprep.subr.bf16.mxu1 %v4187_v23 }
 0x4d1   : > { %3080 = vmatpush3.bf16.msra.mxu1 %v1531_v4 }
 0x4d2   : > { %3081 = vmatprep.subr.bf16.mxu1 %v4187_v23 }
 0x4d5   : > { %3082 = vmatpush3.bf16.msra.mxu1 %v1529_v5 }
 0x4d6   : > { %3083 = vmatprep.subr.bf16.mxu1 %v4187_v23 }
 0x4d9   : > { %3084 = vmatpush3.bf16.msra.mxu1 %v1527_v6 }
 0x4da   : > { %3097 = vmatprep.subr.bf16.mxu1 %v4187_v23 }
 0x58c   : > { %v1508_v8 = vpop.f32.mrf.mxu1 }
 0x58d   : > { %3499 = vrcp.f32 %v1508_v8 }
 0x58e   : > { %v3075_v9 = vpop.f32.mrf.mxu1 }
 0x590   : > { %v1511_v10 = vpop.f32.mrf.mxu1 }
 0x591   : > { %3501 = vrcp.f32 %v1511_v10 }
 0x592   : > { %v3076_v11 = vpop.f32.mrf.mxu1 }
 0x59a   : > { %v3500_v12 = vpop.eup %3499 }
 0x59b   : > { %v1517_v13 = vmul.f32 %v3500_v12, %v3496_v0  ;;  %v3471_v0 = vld [vmem:[#allocation22 + $0x8] sm:$0xff]  }
 0x59d   : > { %v1519_v21 = vmul.f32 %v1517_v13, %v4808_v16 }
 0x59e   : > { %v3502_v15 = vpop.eup %3501 }
 0x59f   : > { %v1518_v20 = vmul.f32 %v3502_v15, %v3498_v1  ;;  %v3472_v1 = vld [vmem:[#allocation22] sm:$0xff]  }
 0x5a1   : > { %v1520_v24 = vmul.f32 %v1518_v20, %v4810_v17 }
 0x5a3   : > { %v1521_v25 = vpack.c.bf16 %v1520_v24, %v1519_v21 }
 0x5a5   : > { %3086 = vmatmul.mubr.msk.bf16.vlgmr.msra.gmra.mxu1 %vm1433_vm6, %v1521_v25 }
 0x5a6   : > { %3101 = vmatprep.mubr.msk.bf16.mxu1 %vm4188_vm1, %v4187_v23  ;;  %3098 = vmatpush3.bf16.msra.mxu1 %v3471_v0  ;;  %v1772_v0 = vld [vmem:[#allocation7] sm:$0xff] }
 0x5a7   : > { %3099 = vmatprep.subr.bf16.mxu1 %v4187_v23 }
 0x5aa   : > { %3100 = vmatpush3.bf16.msra.mxu1 %v3472_v1 }
 0x5ab   : > { %3117 = vmatprep.subr.bf16.mxu1 %v4187_v23 }
 0x665   : > { %v1575_v30 = vpop.f32.mrf.mxu1 }
 0x667   : > { %v3087_v31 = vpop.f32.mrf.mxu1 }
 0x669   : > { %v1578_v32 = vpop.f32.mrf.mxu1 }
 0x66a   : > { %v1586_v33 = vpack.c.bf16 %v1578_v32, %v1575_v30 }
 0x66b   : > { %v3088_v34 = vpop.f32.mrf.mxu1 }
 0x66c   : > { %3094 = vmatmul.mubr.msk.bf16.vlgmr.msra.gmra.mxu0 %vm1188_vm0, %v1586_v33 }
 0x66d   : > { %3113 = vmatprep.mubr.msk.bf16.mxu0 %vm4188_vm1, %v4187_v23 }
 0x72c   : > { %v1643_v37 = vpop.f32.mrf.mxu0 }
 0x72d   : > { %v1644_v38 = vadd.f32 %v2928_v35, %v1643_v37 }
 0x72e   : > { %v3095_v39 = vpop.f32.mrf.mxu0 }
 0x72f   : > { %v1650_v14 = vadd.f32 %v1644_v38, %v1644_v38 }
 0x730   : > { %v1646_v40 = vpop.f32.mrf.mxu0 }
 0x731   : > { %v1647_v18 = vadd.f32 %v2928_v35, %v1646_v40  ;;  %v1652_v41 = vsel %vm1188_vm0, %v1650_v14, 0.0  ;;  %v1693_v35 = vrot.slane %v4758_v19, %v4728_v29 }
 0x732   : > { %1653 = vadd.xlane.f32.xlu0 %v1652_v41  ;;  %v3096_v42 = vpop.f32.mrf.mxu0 }
 0x733   : > { %v1651_v28 = vadd.f32 %v1647_v18, %v1647_v18 }
 0x735   : > { %v1655_v43 = vsel %vm1188_vm0, %v1651_v28, 0.0 }
 0x736   : > { %1656 = vadd.xlane.f32.xlu1 %v1655_v43 }
 0x747   : > { %1796 = vrot.lane.b32.xlu1 %v4742_v51, %s4190_s16 }
 0x74b   : > { %1794 = vrot.lane.b32.xlu1 %v4747_v57, %s4190_s16 }
 0x74f   : > { %1792 = vrot.lane.b32.xlu1 %v4752_v63, %s4190_s16 }
 0x7bb   : > { %v1654_v44 = vpop.xlane.xlu0 %1653 }
 0x7bc   : > { %v1658_v46 = vmul.f32 0.03125, %v1654_v44 }
 0x7be   : > { %v1660_v47 = vsub.f32 %v1650_v14, %v1658_v46  ;;  %v1701_v14 = vrot.slane %v4762_v22, %v4728_v29  ;;  %v2932_v29 = vld [vmem:[#allocation23] ss:$0 sm:$0xff] }
 0x7bf   : > { %v1657_v50 = vpop.xlane.xlu1 %1656 }
 0x7c0   : > { %v1659_v56 = vmul.f32 0.03125, %v1657_v50  ;;  %v1662_v58 = vmul.f32 %v1660_v47, %v1660_v47  ;;  %v1694_v39 = vmul.f32 %v1693_v35, %v1660_v47  ;;  %v1778_v50 = vld [vmem:[#allocation7 + $0x30] sm:$0xff] }
 0x7c2   : > { %v1661_v59 = vsub.f32 %v1651_v28, %v1659_v56  ;;  %v1664_v60 = vsel %vm1188_vm0, %v1662_v58, 0.0  ;;  %v1776_v56 = vld [vmem:[#allocation7 + $0x20] sm:$0xff]  ;;  %v1774_v58 = vld [vmem:[#allocation7 + $0x10] sm:$0xff] }
 0x7c3   : > { %1665 = vadd.xlane.f32.xlu0 %v1664_v60  ;;  %v1797_v8 = vpop.permute.xlu1 %1796  ;;  %v1779_v60 = vld [vmem:[#allocation7 + $0x38] sm:$0xff] }
 0x7c4   : > { %v1663_v61 = vmul.f32 %v1661_v59, %v1661_v59  ;;  %v1810_v10 = vsel %vm1188_vm0, %v1797_v8, 0  ;;  %v1695_v40 = vmul.f32 %v1693_v35, %v1661_v59 }
 0x7c6   : > { %v1667_v62 = vsel %vm1188_vm0, %v1663_v61, 0.0  ;;  %v1775_v61 = vld [vmem:[#allocation7 + $0x18] sm:$0xff] }
 0x7c7   : > { %1668 = vadd.xlane.f32.xlu0 %v1667_v62  ;;  %v1795_v25 = vpop.permute.xlu1 %1794 }
 0x7c8   : > { %v1807_v32 = vsel %vm1188_vm0, %v1795_v25, 0 }
 0x7cb   : > { %v1793_v34 = vpop.permute.xlu1 %1792 }
 0x7cc   : > { %v1804_v37 = vsel %vm1188_vm0, %v1793_v34, 0 }
 0x7dd   : > { %1798 = vrot.lane.b32.xlu0 %v4736_v48, %s4190_s16 }
 0x84c   : > { %v1666_v2 = vpop.xlane.xlu0 %1665 }
 0x84d   : > { %v1670_v3 = vmul.f32 0.032258064, %v1666_v2 }
 0x84f   : > { %3503 = vrsqrt.f32 %v1670_v3  ;;  %vm1674_vm7 = vcmp.eq.f32.partialorder %v1670_v3, inf  ;;  %v1677_v12 = vand.u32 2147483648, %v1670_v3  ;;  %vm1676_vm8 = vcmp.eq.f32.partialorder %v1670_v3, 0.0 }
 0x850   : > { %v1669_v4 = vpop.xlane.xlu0 %1668 }
 0x851   : > { %v1671_v5 = vmul.f32 0.032258064, %v1669_v4 }
 0x853   : > { %3505 = vrsqrt.f32 %v1671_v5  ;;  %vm1681_vm9 = vcmp.eq.f32.partialorder %v1671_v5, inf  ;;  %v1684_v27 = vand.u32 2147483648, %v1671_v5  ;;  %vm1683_vm10 = vcmp.eq.f32.partialorder %v1671_v5, 0.0 }
 0x854   : > { %v1799_v6 = vpop.permute.xlu0 %1798 }
 0x855   : > { %v1813_v7 = vsel %vm1188_vm0, %v1799_v6, 0 }
 0x856   : > { %3106 = vmatpush3.bf16.xpose.msra.mxu0 %v1813_v7 }
 0x857   : > { %3107 = vmatprep.subr.bf16.mxu0 %v4187_v23 }
 0x85c   : > { %v3504_v9 = vpop.eup %3503 }
 0x85d   : > { %v1673_v11 = vmul.f32 %v3504_v9, %v1670_v3 }
 0x85e   : > { %3108 = vmatpush3.bf16.xpose.msra.mxu0 %v1810_v10 }
 0x85f   : > { %v1675_v13 = vsel %vm1674_vm7, %v1670_v3, %v1673_v11  ;;  %3109 = vmatprep.subr.bf16.mxu0 %v4187_v23 }
 0x860   : > { %v3506_v15 = vpop.eup %3505  ;;  %v1678_v20 = vsel %vm1676_vm8, %v1677_v12, %v1675_v13 }
 0x861   : > { %v1686_v21 = vadd.f32 1e-06, %v1678_v20  ;;  %v1680_v24 = vmul.f32 %v3506_v15, %v1671_v5 }
 0x863   : > { %3507 = vrcp.f32 %v1686_v21  ;;  %v1682_v30 = vsel %vm1681_vm9, %v1671_v5, %v1680_v24 }
 0x864   : > { %v1685_v31 = vsel %vm1683_vm10, %v1684_v27, %v1682_v30 }
 0x865   : > { %v1687_v33 = vadd.f32 1e-06, %v1685_v31 }
 0x866   : > { %3110 = vmatpush3.bf16.xpose.msra.mxu0 %v1807_v32 }
 0x867   : > { %3509 = vrcp.f32 %v1687_v33  ;;  %3111 = vmatprep.subr.bf16.mxu0 %v4187_v23 }
 0x86e   : > { %3112 = vmatpush3.bf16.xpose.msra.mxu0 %v1804_v37 }
 0x86f   : > { %3141 = vmatprep.subr.bf16.mxu0 %v4187_v23 }
 0x870   : > { %v3508_v38 = vpop.eup %3507 }
 0x871   : > { %v1696_v18 = vmul.f32 %v3508_v38, %v1694_v39 }
 0x873   : > { %v1702_v28 = vadd.f32 %v1701_v14, %v1696_v18 }
 0x874   : > { %v3510_v41 = vpop.eup %3509 }
 0x875   : > { %v1697_v42 = vmul.f32 %v3510_v41, %v1695_v40 }
 0x877   : > { %v1703_v43 = vadd.f32 %v1701_v14, %v1697_v42 }
 0x879   : > { %v1708_v44 = vpack.c.bf16 %v1703_v43, %v1702_v28 }
 0x87b   : > { %3102 = vmatmul.mubr.msk.bf16.vlgmr.msra.gmra.mxu1 %vm1188_vm0, %v1708_v44 }
 0x87c   : > { %3118 = vmatpush3.bf16.msra.mxu1 %v4776_v52  ;;  %3125 = vmatprep.mubr.msk.bf16.mxu1 %vm4188_vm1, %v4187_v23 }
 0x87d   : > { %3119 = vmatprep.subr.bf16.mxu1 %v4187_v23 }
 0x880   : > { %3120 = vmatpush3.bf16.msra.mxu1 %v4780_v53  ;;  %v1777_v53 = vld [vmem:[#allocation7 + $0x28] sm:$0xff] }
 0x881   : > { %3121 = vmatprep.subr.bf16.mxu1 %v4187_v23 }
 0x884   : > { %3122 = vmatpush3.bf16.msra.mxu1 %v4788_v54  ;;  %v1773_v54 = vld [vmem:[#allocation7 + $0x8] sm:$0xff] }
 0x885   : > { %3123 = vmatprep.subr.bf16.mxu1 %v4187_v23 }
 0x888   : > { %3124 = vmatpush3.bf16.msra.mxu1 %v4793_v55 }
 0x889   : > { %3129 = vmatprep.subr.bf16.mxu1 %v4187_v23 }
 0x93b   : > { %v1765_v46 = vpop.f32.mrf.mxu1 }
 0x93c   : > { %v1766_v52 = vadd.f32 %v2932_v29, %v1765_v46 }
 0x93d   : > { %v3103_v47 = vpop.f32.mrf.mxu1 }
 0x93e   : > { %v1786_v2 = vmul.f32 %v1778_v50, %v1766_v52  ;;  %v1784_v3 = vmul.f32 %v1776_v56, %v1766_v52  ;;  %v1782_v55 = vmul.f32 %v1774_v58, %v1766_v52  ;;  %v1780_v8 = vmul.f32 %v1772_v0, %v1766_v52 }
 0x93f   : > { %v1768_v59 = vpop.f32.mrf.mxu1 }
 0x940   : > { %v1769_v62 = vadd.f32 %v2932_v29, %v1768_v59  ;;  %v3474_v59 = vld [vmem:[#allocation28] sm:$0xff]  }
 0x941   : > { %v3104_v1 = vpop.f32.mrf.mxu1 }
 0x942   : > { %v1788_v4 = vpack.c.bf16 %v1769_v62, %v1766_v52  ;;  %v1787_v5 = vmul.f32 %v1779_v60, %v1769_v62  ;;  %v1785_v6 = vmul.f32 %v1777_v53, %v1769_v62  ;;  %v1783_v7 = vmul.f32 %v1775_v61, %v1769_v62 }
 0x943   : > { %v1781_v9 = vmul.f32 %v1773_v54, %v1769_v62 }
 0x944   : > { %1790 = vrot.lane.b32.xlu0 %v1788_v4, %s4190_s16  ;;  %v4859_v10 = vpack.c.bf16 %v1787_v5, %v1786_v2  ;;  %v4861_v11 = vpack.c.bf16 %v1785_v6, %v1784_v3  ;;  %v4863_v12 = vpack.c.bf16 %v1783_v7, %v1782_v55  ;;  %v3475_v3 = vld [vmem:[#allocation13 + $0x18] sm:$0xff]   ;;  %v3476_v55 = vld [vmem:[#allocation13 + $0x10] sm:$0xff]   ;;  %v3477_v4 = vld [vmem:[#allocation13 + $0x8] sm:$0xff]  }
 0x945   : > { %v4865_v13 = vpack.c.bf16 %v1781_v9, %v1780_v8  ;;  %v3478_v5 = vld [vmem:[#allocation13] sm:$0xff]  }
 0x946   : > { %v2062_v56 = vsel %vm1188_vm0, %v4859_v10, 0  ;;  %v2059_v58 = vsel %vm1188_vm0, %v4861_v11, 0 }
 0x9b6   : > { %v1791_v15 = vpop.permute.xlu0 %1790 }
 0x9b7   : > { %3114 = vmatmul.mubr.msk.bf16.vlgmr.msra.gmra.mxu0 %vm1188_vm0, %v1791_v15 }
 0x9b8   : > { %3145 = vmatprep.mubr.msk.bf16.mxu0 %vm4188_vm1, %v4187_v23 }
 0xa77   : > { %v1849_v20 = vpop.f32.mrf.mxu0 }
 0xa78   : > { %v1856_v21 = vsel %vm1433_vm6, %v1849_v20, -inf }
 0xa79   : > { %1857 = vmax.xlane.f32.xlu1 %v1856_v21  ;;  %v3115_v24 = vpop.f32.mrf.mxu0 }
 0xa7b   : > { %v1852_v25 = vpop.f32.mrf.mxu0 }
 0xa7c   : > { %v1859_v27 = vsel %vm1433_vm6, %v1852_v25, -inf }
 0xa7d   : > { %1860 = vmax.xlane.f32.xlu0 %v1859_v27  ;;  %v3116_v30 = vpop.f32.mrf.mxu0  ;;  %v2939_v27 = vld [vmem:[%s5109_s19] ss:$0 sm:$0xff] }
 0xa8a   : > { %1924 = vrot.lane.b32.xlu1 %v4742_v51, %s4191_s0 }
 0xa8e   : > { %1922 = vrot.lane.b32.xlu1 %v4747_v57, %s4191_s0 }
 0xa93   : > { %1926 = vrot.lane.b32.xlu0 %v4736_v48, %s4191_s0 }
 0xa97   : > { %1920 = vrot.lane.b32.xlu0 %v4752_v63, %s4191_s0  ;;  %v3473_v63 = vld [vmem:[#allocation28 + $0x8] sm:$0xff]   ;;  %s5210_s0 = sld [smem:[#allocation66_spill]] }
 0xa98   : > { %3142 = vmatpush3.bf16.msra.mxu0 %v3473_v63 }
 0xa99   : > { %3143 = vmatprep.subr.bf16.mxu0 %v4187_v23 }
 0xa9c   : > { %3144 = vmatpush3.bf16.msra.mxu0 %v3474_v59 }
 0xa9d   : > { %3161 = vmatprep.subr.bf16.mxu0 %v4187_v23 }
 0xb02   : > { %v1858_v31 = vpop.xlane.xlu1 %1857 }
 0xb03   : > { %v1862_v32 = vsub.f32 %v1849_v20, %v1858_v31 }
 0xb05   : > { %v1864_v33 = vmul.f32 1.442695, %v1862_v32 }
 0xb06   : > { %v1861_v34 = vpop.xlane.xlu0 %1860  ;;  %v1925_v48 = vpop.permute.xlu1 %1924 }
 0xb07   : > { %v1863_v35 = vsub.f32 %v1852_v25, %v1861_v34  ;;  %3511 = vpow2.f32 %v1864_v33 }
 0xb09   : > { %v1866_v37 = vmul.f32 1.442695, %v1863_v35 }
 0xb0a   : > { %v1927_v40 = vpop.permute.xlu0 %1926  ;;  %v1923_v51 = vpop.permute.xlu1 %1922 }
 0xb0b   : > { %3513 = vpow2.f32 %v1866_v37 }
 0xb0e   : > { %v1921_v57 = vpop.permute.xlu0 %1920 }
 0xb14   : > { %v3512_v38 = vpop.eup %3511 }
 0xb18   : > { %v3514_v39 = vpop.eup %3513 }
 0xb19   : > { %v1868_v14 = vpack.c.bf16 %v3514_v39, %v3512_v38 }
 0xb1b   : > { %3126 = vmatmul.mubr.msk.bf16.vlgmr.msra.gmra.mxu1 %vm1433_vm6, %v1868_v14 }
 0xb1c   : > { %3130 = vmatpush3.bf16.msra.mxu1 %v1927_v40  ;;  %3137 = vmatprep.mubr.msk.bf16.mxu1 %vm4188_vm1, %v4187_v23 }
 0xb1d   : > { %3131 = vmatprep.subr.bf16.mxu1 %v4187_v23 }
 0xb20   : > { %3132 = vmatpush3.bf16.msra.mxu1 %v1925_v48 }
 0xb21   : > { %3133 = vmatprep.subr.bf16.mxu1 %v4187_v23 }
 0xb24   : > { %3134 = vmatpush3.bf16.msra.mxu1 %v1923_v51 }
 0xb25   : > { %3135 = vmatprep.subr.bf16.mxu1 %v4187_v23 }
 0xb28   : > { %3136 = vmatpush3.bf16.msra.mxu1 %v1921_v57 }
 0xb29   : > { %3149 = vmatprep.subr.bf16.mxu1 %v4187_v23 }
 0xbdb   : > { %v1906_v18 = vpop.f32.mrf.mxu1 }
 0xbdc   : > { %3515 = vrcp.f32 %v1906_v18 }
 0xbdd   : > { %v3127_v41 = vpop.f32.mrf.mxu1 }
 0xbdf   : > { %v1909_v42 = vpop.f32.mrf.mxu1 }
 0xbe0   : > { %3517 = vrcp.f32 %v1909_v42 }
 0xbe1   : > { %v3128_v28 = vpop.f32.mrf.mxu1 }
 0xbe9   : > { %v3516_v43 = vpop.eup %3515 }
 0xbea   : > { %v1915_v44 = vmul.f32 %v3516_v43, %v3512_v38 }
 0xbec   : > { %v1917_v52 = vmul.f32 %v1915_v44, %v4808_v16  ;;  %v2056_v16 = vsel %vm1188_vm0, %v4863_v12, 0 }
 0xbed   : > { %v3518_v29 = vpop.eup %3517 }
 0xbee   : > { %v1916_v46 = vmul.f32 %v3518_v29, %v3514_v39 }
 0xbf0   : > { %v1918_v47 = vmul.f32 %v1916_v46, %v4810_v17  ;;  %v2053_v17 = vsel %vm1188_vm0, %v4865_v13, 0 }
 0xbf2   : > { %v1919_v50 = vpack.c.bf16 %v1918_v47, %v1917_v52 }
 0xbf4   : > { %3138 = vmatmul.mubr.msk.bf16.vlgmr.msra.gmra.mxu1 %vm1433_vm6, %v1919_v50 }
 0xbf5   : > { %3150 = vmatpush3.bf16.xpose.msra.mxu1 %v2062_v56  ;;  %3157 = vmatprep.mubr.msk.bf16.mxu1 %vm4188_vm1, %v4187_v23 }
 0xbf6   : > { %3151 = vmatprep.subr.bf16.mxu1 %v4187_v23 }
 0xbfd   : > { %3152 = vmatpush3.bf16.xpose.msra.mxu1 %v2059_v58  ;;  %v1141_v58 = vld [vmem:[#allocation11] sm:$0xff] }
 0xbfe   : > { %3153 = vmatprep.subr.bf16.mxu1 %v4187_v23 }
 0xc05   : > { %3154 = vmatpush3.bf16.xpose.msra.mxu1 %v2056_v16 }
 0xc06   : > { %3155 = vmatprep.subr.bf16.mxu1 %v4187_v23 }
 0xc0d   : > { %3156 = vmatpush3.bf16.xpose.msra.mxu1 %v2053_v17 }
 0xc0e   : > { %3185 = vmatprep.subr.bf16.mxu1 %v4187_v23 }
 0xc14   : > { %3158 = vmatmul.mubr.msk.bf16.vlgmr.msra.gmra.mxu1 %vm1188_vm0, %v2044_v49 }
 0xc15   : > { %3189 = vmatprep.mubr.msk.bf16.mxu1 %vm4188_vm1, %v4187_v23 }
 0xcb4   : > { %v1969_v60 = vpop.f32.mrf.mxu1 }
 0xcb6   : > { %v3139_v53 = vpop.f32.mrf.mxu1 }
 0xcb8   : > { %v1972_v61 = vpop.f32.mrf.mxu1 }
 0xcb9   : > { %v1980_v62 = vpack.c.bf16 %v1972_v61, %v1969_v60 }
 0xcba   : > { %v3140_v0 = vpop.f32.mrf.mxu1 }
 0xcbb   : > { %3146 = vmatmul.mubr.msk.bf16.vlgmr.msra.gmra.mxu0 %vm1188_vm0, %v1980_v62 }
 0xcbc   : > { %3169 = vmatprep.mubr.msk.bf16.mxu0 %vm4188_vm1, %v4187_v23  ;;  %3162 = vmatpush3.bf16.msra.mxu0 %v3475_v3 }
 0xcbd   : > { %3163 = vmatprep.subr.bf16.mxu0 %v4187_v23 }
 0xcc0   : > { %3164 = vmatpush3.bf16.msra.mxu0 %v3476_v55 }
 0xcc1   : > { %3165 = vmatprep.subr.bf16.mxu0 %v4187_v23 }
 0xcc4   : > { %3166 = vmatpush3.bf16.msra.mxu0 %v3477_v4 }
 0xcc5   : > { %3167 = vmatprep.subr.bf16.mxu0 %v4187_v23 }
 0xcc8   : > { %3168 = vmatpush3.bf16.msra.mxu0 %v3478_v5 }
 0xcc9   : > { %3173 = vmatprep.subr.bf16.mxu0 %v4187_v23 }
 0xcd4   : > { %v2098_v36 = vpop.f32.mrf.mxu1 }
 0xcd5   : > { %v2105_v45 = vsel %vm1433_vm6, %v2098_v36, -inf }
 0xcd6   : > { %2106 = vmax.xlane.f32.xlu1 %v2105_v45  ;;  %v3159_v49 = vpop.f32.mrf.mxu1 }
 0xcd8   : > { %v2101_v54 = vpop.f32.mrf.mxu1 }
 0xcd9   : > { %v2108_v1 = vsel %vm1433_vm6, %v2101_v54, -inf }
 0xcda   : > { %2109 = vmax.xlane.f32.xlu0 %v2108_v1  ;;  %v3160_v2 = vpop.f32.mrf.mxu1 }
 0xd5f   : > { %v2107_v6 = vpop.xlane.xlu1 %2106 }
 0xd60   : > { %v2111_v7 = vsub.f32 %v2098_v36, %v2107_v6  ;;  %v3480_v6 = vld [vmem:[#allocation31] sm:$0xff]  }
 0xd62   : > { %v2113_v8 = vmul.f32 1.442695, %v2111_v7 }
 0xd63   : > { %v2110_v9 = vpop.xlane.xlu0 %2109 }
 0xd64   : > { %v2112_v15 = vsub.f32 %v2101_v54, %v2110_v9  ;;  %3519 = vpow2.f32 %v2113_v8  ;;  %v3479_v54 = vld [vmem:[#allocation31 + $0x8] sm:$0xff]  }
 0xd66   : > { %v2115_v20 = vmul.f32 1.442695, %v2112_v15 }
 0xd68   : > { %3521 = vpow2.f32 %v2115_v20  ;;  %v2363_v20 = vsub.s32 2, %v4722_v26  ;;  %v3482_v26 = vld [vmem:[#allocation29] sm:$0xff]  }
 0xd71   : > { %v3520_v21 = vpop.eup %3519 }
 0xd75   : > { %v3522_v24 = vpop.eup %3521 }
 0xd76   : > { %v2117_v25 = vpack.c.bf16 %v3522_v24, %v3520_v21 }
 0xd78   : > { %3170 = vmatmul.mubr.msk.bf16.vlgmr.msra.gmra.mxu0 %vm1433_vm6, %v2117_v25 }
 0xd79   : > { %3181 = vmatprep.mubr.msk.bf16.mxu0 %vm4188_vm1, %v4187_v23 }
 0xd7b   : > { %v2037_v30 = vpop.f32.mrf.mxu0 }
 0xd7c   : > { %v2038_v31 = vadd.f32 %v2939_v27, %v2037_v30 }
 0xd7d   : > { %v3147_v32 = vpop.f32.mrf.mxu0 }
 0xd7e   : > { %v4923_v33 = vadd.f32 %v2038_v31, %v2038_v31 }
 0xd7f   : > { %v2040_v34 = vpop.f32.mrf.mxu0 }
 0xd80   : > { %v2041_v35 = vadd.f32 %v2939_v27, %v2040_v34  ;;  %v2323_v37 = vsel %vm1188_vm0, %v4923_v33, 0.0  ;;  %v2372_v27 = vrot.slane %v4762_v22, %v2363_v20 }
 0xd81   : > { %v3148_v38 = vpop.f32.mrf.mxu0  ;;  %2324 = vadd.xlane.f32.xlu0 %v2323_v37 }
 0xd82   : > { %v4927_v39 = vadd.f32 %v2041_v35, %v2041_v35 }
 0xd84   : > { %v2326_v14 = vsel %vm1188_vm0, %v4927_v39, 0.0 }
 0xd85   : > { %2327 = vadd.xlane.f32.xlu0 %v2326_v14  ;;  %v3481_v14 = vld [vmem:[#allocation29 + $0x8] sm:$0xff]  }
 0xd86   : > { %3186 = vmatpush3.bf16.msra.mxu1 %v3481_v14 }
 0xd87   : > { %3187 = vmatprep.subr.bf16.mxu1 %v4187_v23 }
 0xd8a   : > { %3188 = vmatpush3.bf16.msra.mxu1 %v3482_v26 }
 0xd8b   : > { %3201 = vmatprep.subr.bf16.mxu1 %v4187_v23 }
 0xe0a   : > { %v2325_v40 = vpop.xlane.xlu0 %2324 }
 0xe0b   : > { %v2329_v48 = vmul.f32 0.03125, %v2325_v40 }
 0xe0d   : > { %v4932_v51 = vsub.f32 %v4923_v33, %v2329_v48  ;;  %v3483_v48 = vld [vmem:[%s5114_s24 + $0x18] sm:$0xff]  }
 0xe0e   : > { %v2328_v57 = vpop.xlane.xlu0 %2327 }
 0xe0f   : > { %v2330_v63 = vmul.f32 0.03125, %v2328_v57  ;;  %v2333_v18 = vmul.f32 %v4932_v51, %v4932_v51 }
 0xe11   : > { %v4937_v41 = vsub.f32 %v4927_v39, %v2330_v63  ;;  %v2335_v42 = vsel %vm1188_vm0, %v2333_v18, 0.0  ;;  %v3484_v63 = vld [vmem:[%s5114_s24 + $0x10] sm:$0xff]   ;;  %v3485_v18 = vld [vmem:[%s5114_s24 + $0x8] sm:$0xff]  }
 0xe12   : > { %2336 = vadd.xlane.f32.xlu1 %v2335_v42  ;;  %v2954_v42 = vld [vmem:[%s5113_s23] ss:$0 sm:$0xff] }
 0xe13   : > { %v2334_v28 = vmul.f32 %v4937_v41, %v4937_v41 }
 0xe15   : > { %v2338_v43 = vsel %vm1188_vm0, %v2334_v28, 0.0 }
 0xe16   : > { %2339 = vadd.xlane.f32.xlu0 %v2338_v43 }
 0xe23   : > { %2203 = vrot.lane.b32.xlu1 %v4859_v10, %s4189_s17  ;;  %v1142_v10 = vld [vmem:[#allocation11 + $0x8] sm:$0xff] }
 0xe27   : > { %2199 = vrot.lane.b32.xlu1 %v4863_v12, %s4189_s17 }
 0xe2b   : > { %2197 = vrot.lane.b32.xlu1 %v4865_v13, %s4189_s17 }
 0xe2c   : > { %2201 = vrot.lane.b32.xlu0 %v4861_v11, %s4189_s17 }
 0xe38   : > { %v2179_v44 = vpop.f32.mrf.mxu0 }
 0xe39   : > { %3523 = vrcp.f32 %v2179_v44 }
 0xe3a   : > { %v3171_v29 = vpop.f32.mrf.mxu0 }
 0xe3c   : > { %v2182_v46 = vpop.f32.mrf.mxu0 }
 0xe3d   : > { %3525 = vrcp.f32 %v2182_v46 }
 0xe3e   : > { %v3172_v52 = vpop.f32.mrf.mxu0 }
 0xe46   : > { %v3524_v47 = vpop.eup %3523 }
 0xe47   : > { %v2188_v50 = vmul.f32 %v3524_v47, %v3520_v21  ;;  %v2364_v21 = vrot.slane %v4758_v19, %v2363_v20 }
 0xe49   : > { %v2190_v17 = vmul.f32 %v2188_v50, %v1141_v58  ;;  %v2365_v25 = vmul.f32 %v2364_v21, %v4932_v51  ;;  %v2366_v30 = vmul.f32 %v2364_v21, %v4937_v41  ;;  %v3486_v41 = vld [vmem:[%s5114_s24] sm:$0xff]  }
 0xe4a   : > { %v3526_v56 = vpop.eup %3525 }
 0xe4b   : > { %v2189_v16 = vmul.f32 %v3526_v56, %v3522_v24 }
 0xe4d   : > { %v2191_v12 = vmul.f32 %v2189_v16, %v1142_v10 }
 0xe4f   : > { %v2192_v59 = vpack.c.bf16 %v2191_v12, %v2190_v17 }
 0xe9b   : > { %v2337_v60 = vpop.xlane.xlu1 %2336 }
 0xe9c   : > { %v2341_v13 = vmul.f32 0.032258064, %v2337_v60 }
 0xe9e   : > { %3527 = vrsqrt.f32 %v2341_v13  ;;  %vm2345_vm11 = vcmp.eq.f32.partialorder %v2341_v13, inf  ;;  %v2348_v1 = vand.u32 2147483648, %v2341_v13  ;;  %vm2347_vm12 = vcmp.eq.f32.partialorder %v2341_v13, 0.0 }
 0xe9f   : > { %v2204_v53 = vpop.permute.xlu1 %2203  ;;  %v2340_v11 = vpop.xlane.xlu0 %2339 }
 0xea0   : > { %v2342_v61 = vmul.f32 0.032258064, %v2340_v11  ;;  %3174 = vmatpush3.bf16.msra.mxu0 %v2204_v53 }
 0xea1   : > { %3175 = vmatprep.subr.bf16.mxu0 %v4187_v23 }
 0xea2   : > { %3529 = vrsqrt.f32 %v2342_v61  ;;  %vm2352_vm13 = vcmp.eq.f32.partialorder %v2342_v61, inf  ;;  %v2355_v7 = vand.u32 2147483648, %v2342_v61  ;;  %vm2354_vm14 = vcmp.eq.f32.partialorder %v2342_v61, 0.0 }
 0xea3   : > { %v2202_v62 = vpop.permute.xlu0 %2201  ;;  %v2200_v0 = vpop.permute.xlu1 %2199 }
 0xea4   : > { %3176 = vmatpush3.bf16.msra.mxu0 %v2202_v62 }
 0xea5   : > { %3177 = vmatprep.subr.bf16.mxu0 %v4187_v23 }
 0xea7   : > { %v2198_v45 = vpop.permute.xlu1 %2197 }
 0xea8   : > { %3178 = vmatpush3.bf16.msra.mxu0 %v2200_v0 }
 0xea9   : > { %3179 = vmatprep.subr.bf16.mxu0 %v4187_v23 }
 0xeab   : > { %v3528_v36 = vpop.eup %3527 }
 0xeac   : > { %v2344_v49 = vmul.f32 %v3528_v36, %v2341_v13  ;;  %3180 = vmatpush3.bf16.msra.mxu0 %v2198_v45 }
 0xead   : > { %3193 = vmatprep.subr.bf16.mxu0 %v4187_v23 }
 0xeae   : > { %v2346_v2 = vsel %vm2345_vm11, %v2341_v13, %v2344_v49 }
 0xeaf   : > { %v3530_v3 = vpop.eup %3529  ;;  %v2349_v55 = vsel %vm2347_vm12, %v2348_v1, %v2346_v2  ;;  %3182 = vmatmul.mubr.msk.bf16.vlgmr.msra.gmra.mxu0 %vm1433_vm6, %v2192_v59 }
 0xeb0   : > { %v2357_v4 = vadd.f32 1e-06, %v2349_v55  ;;  %v2351_v5 = vmul.f32 %v3530_v3, %v2342_v61  ;;  %3194 = vmatpush3.bf16.msra.mxu0 %v3479_v54  ;;  %3197 = vmatprep.mubr.msk.bf16.mxu0 %vm4188_vm1, %v4187_v23 }
 0xeb1   : > { %3195 = vmatprep.subr.bf16.mxu0 %v4187_v23 }
 0xeb2   : > { %3531 = vrcp.f32 %v2357_v4  ;;  %v2353_v8 = vsel %vm2352_vm13, %v2342_v61, %v2351_v5 }
 0xeb3   : > { %v2356_v9 = vsel %vm2354_vm14, %v2355_v7, %v2353_v8 }
 0xeb4   : > { %v2358_v15 = vadd.f32 1e-06, %v2356_v9  ;;  %3196 = vmatpush3.bf16.msra.mxu0 %v3480_v6 }
 0xeb6   : > { %3533 = vrcp.f32 %v2358_v15 }
 0xebf   : > { %v3532_v24 = vpop.eup %3531 }
 0xec0   : > { %v2367_v31 = vmul.f32 %v3532_v24, %v2365_v25 }
 0xec2   : > { %v2373_v35 = vadd.f32 %v2372_v27, %v2367_v31 }
 0xec3   : > { %v3534_v32 = vpop.eup %3533 }
 0xec4   : > { %v2368_v34 = vmul.f32 %v3534_v32, %v2366_v30 }
 0xec6   : > { %v2374_v37 = vadd.f32 %v2372_v27, %v2368_v34 }
 0xec8   : > { %v2379_v38 = vpack.c.bf16 %v2374_v37, %v2373_v35 }
 0xeca   : > { %3198 = vmatmul.mubr.msk.bf16.vlgmr.msra.gmra.mxu0 %vm1188_vm0, %v2379_v38 }
 0xf6f   : > { %v2246_v19 = vpop.f32.mrf.mxu0 }
 0xf71   : > { %v3183_v22 = vpop.f32.mrf.mxu0 }
 0xf73   : > { %v2249_v40 = vpop.f32.mrf.mxu0 }
 0xf74   : > { %v2257_v51 = vpack.c.bf16 %v2249_v40, %v2246_v19 }
 0xf75   : > { %v3184_v57 = vpop.f32.mrf.mxu0 }
 0xf76   : > { %3190 = vmatmul.mubr.msk.bf16.vlgmr.msra.gmra.mxu1 %vm1188_vm0, %v2257_v51 }
 0xf77   : > { %3202 = vmatpush3.bf16.msra.mxu1 %v3483_v48  ;;  %3209 = vmatprep.mubr.msk.bf16.mxu1 %vm4188_vm1, %v4187_v23 }
 0xf78   : > { %3203 = vmatprep.subr.bf16.mxu1 %v4187_v23 }
 0xf7b   : > { %3204 = vmatpush3.bf16.msra.mxu1 %v3484_v63 }
 0xf7c   : > { %3205 = vmatprep.subr.bf16.mxu1 %v4187_v23 }
 0xf7f   : > { %3206 = vmatpush3.bf16.msra.mxu1 %v3485_v18 }
 0xf80   : > { %3207 = vmatprep.subr.bf16.mxu1 %v4187_v23  ;;  %v2950_v23 = vld [vmem:[%s5210_s0] ss:$0 sm:$0xff] }
 0xf83   : > { %3208 = vmatpush3.bf16.msra.mxu1 %v3486_v41 }
 0xf8a   : > { %v2436_v28 = vpop.f32.mrf.mxu0 }
 0xf8b   : > { %v2437_v44 = vadd.f32 %v2954_v42, %v2436_v28 }
 0xf8c   : > { %v3199_v43 = vpop.f32.mrf.mxu0 }
 0xf8d   : > { %v2443_v47 = vmax.f32 %v2437_v44, 0.0 }
 0xf8e   : > { %v2439_v29 = vpop.f32.mrf.mxu0 }
 0xf8f   : > { %v2440_v46 = vadd.f32 %v2954_v42, %v2439_v29 }
 0xf90   : > { %v3200_v52 = vpop.f32.mrf.mxu0 }
 0xf91   : > { %v2444_v50 = vmax.f32 %v2440_v46, 0.0 }
 0xf93   : > { %v2453_v56 = vpack.c.bf16 %v2444_v50, %v2443_v47 }
 0xf95   : > { %3210 = vmatmul.mubr.msk.bf16.vlgmr.msra.gmra.mxu1 %vm1433_vm6, %v2453_v56 }
0x1036   : > { %v2314_v58 = vpop.f32.mrf.mxu1 }
0x1037   : > { %v2315_v10 = vadd.f32 %v2950_v23, %v2314_v58 }
0x1038   : > { %v3191_v16 = vpop.f32.mrf.mxu1 }
0x1039   : > { %2534 = vst.msk [vmem:[%s1112_s25] sm:$0xff] %vm1188_vm0, %v2315_v10 }
0x103a   : > { %v2317_v17 = vpop.f32.mrf.mxu1 }
0x103b   : > { %v2318_v12 = vadd.f32 %v2950_v23, %v2317_v17 }
0x103c   : > { %v3192_v59 = vpop.f32.mrf.mxu1 }
0x103d   : > { %2965 = vst.msk [vmem:[%s1112_s25 + $0x8] sm:$0xff] %vm1188_vm0, %v2318_v12 }
0x103e   : > { %4044 = shalt.err (!%p4041_p7)
}
0x103f   : > { %s4045_s17 = scalar_lea.hbm %s5002_s9, 256  ;;  %s4049_s25 = scalar_lea.hbm %s5211_s6, 512 }
0x1040   : > { %p4046_p6 = scmp.ne.s32.totalorder %s5002_s9, %s4045_s17  ;;  %p4050_p12 = scmp.lt.s32.totalorder %s5002_s9, %s5211_s6 }
0x1041   : > { %p4051_p2 = scmp.lt.s32.totalorder %s4049_s25, %s4045_s17 }
0x1042   : > { %p4047_p10 = pnand %p4046_p6, %p5212_p9 }
0x1043   : > { %p4052_p5 = por %p4051_p2, %p4050_p12 }
0x1044   : > { %p4048_p11 = pneg %p4047_p10 }
0x1046   : > { %p4053_p8 = pnand %p4052_p5, %p4048_p11 }
0x1048   : > { %4056 = shalt.err (!%p4053_p8)
}
0x1049   : > { %s4193_s26 = smov 128   ;;  %s4194_s11 = smov 8  }
0x104a   : > { %3288 = dma.vmem_to_hbm [thread:$0]  (%p5212_p9), %s4995_s27, 256, %s5002_s9, %s2545_s1, %s4193_s26, %s4193_s26, %s4194_s11  }
0x104b   : > { %s5213_s17 = sld [smem:[#allocation68_spill]]  ;;  %s1105_s16 = scalar_lea.vmem [#allocation32], %s4637_s22 }
0x104c   : > { %s2558_s0 = sshll.u32 %s1105_s16, 4  ;;  %s5214_s1 = sld [smem:[#allocation69_spill]]  ;;  %s5045_s0 = int_to_ptr.vmem [resolvable:$true] %s2558_s0 }
0x104d   : > { %s2540_s22 = scalar_lea.sflag [#allocation4], %s4634_s18  ;;  %s4057_s29 = scalar_lea.vmem %s5045_s0, 256 }
0x104e   : > { %p4058_p1 = scmp.ne.s32.totalorder %s5045_s0, %s4057_s29  ;;  %s4195_s21 = smov [#allocation32]  }
0x104f   : > { %s4061_s28 = sshll.u32 %s4195_s21, 4  ;;  %s4062_s28 = int_to_ptr.vmem [resolvable:$false] %s4061_s28 }
0x1050   : > { %p4059_p3 = pnand %p4058_p1, %p5212_p9  ;;  %s4063_s15 = scalar_lea.vmem %s4062_s28, 512 }
0x1051   : > { %v2963_v13 = vld [vmem:[%s5213_s17] ss:$0 sm:$0xff]  ;;  %p4064_p13 = scmp.lt.s32.totalorder %s5045_s0, %s4062_s28  ;;  %p4065_p0 = scmp.lt.s32.totalorder %s4063_s15, %s4057_s29 }
0x1052   : > { %s5043_s25 = scalar_lea.hbm %s5214_s1, %s2975_s5  ;;  %p4060_p4 = pneg %p4059_p3 }
0x1053   : > { %p4066_p7 = por %p4065_p0, %p4064_p13 }
0x1055   : > { %v2515_v60 = vpop.f32.mrf.mxu1  ;;  %p4067_p6 = pnand %p4066_p7, %p4060_p4 }
0x1056   : > { %v2522_v53 = vadd.f32 %v2515_v60, %v4923_v33 }
0x1057   : > { %v3211_v11 = vpop.f32.mrf.mxu1 }
0x1058   : > { %v2531_v61 = vadd.f32 %v2963_v13, %v2522_v53 }
0x1059   : > { %v2518_v62 = vpop.f32.mrf.mxu1 }
0x105a   : > { %2533 = vst.msk [vmem:[%s1105_s16] sm:$0xff] %vm1188_vm0, %v2531_v61  ;;  %v2523_v0 = vadd.f32 %v2518_v62, %v4927_v39 }
0x105b   : > { %v3212_v36 = vpop.f32.mrf.mxu1 }
0x105c   : > { %v2532_v45 = vadd.f32 %v2963_v13, %v2523_v0 }
0x105e   : > { %2964 = vst.msk [vmem:[%s1105_s16 + $0x8] sm:$0xff] %vm1188_vm0, %v2532_v45 }
0x105f   : > { %4070 = shalt.err (!%p4067_p6)
}
0x1060   : > { %s4071_s5 = scalar_lea.hbm %s5043_s25, 256  ;;  %s4075_s17 = scalar_lea.hbm %s5214_s1, 512 }
0x1061   : > { %p4072_p10 = scmp.ne.s32.totalorder %s5043_s25, %s4071_s5  ;;  %p4076_p2 = scmp.lt.s32.totalorder %s5043_s25, %s5214_s1 }
0x1062   : > { %p4077_p5 = scmp.lt.s32.totalorder %s4075_s17, %s4071_s5 }
0x1063   : > { %p4073_p11 = pnand %p4072_p10, %p5212_p9 }
0x1064   : > { %p4078_p8 = por %p4077_p5, %p4076_p2 }
0x1065   : > { %p4074_p12 = pneg %p4073_p11 }
0x1067   : > { %p4079_p1 = pnand %p4078_p8, %p4074_p12 }
0x1069   : > { %4082 = shalt.err (!%p4079_p1)
}
0x106a   : > { %3287 = dma.vmem_to_hbm [thread:$0]  (%p5212_p9), %s5045_s0, 256, %s5043_s25, %s2540_s22, %s4193_s26, %s4193_s26, %s4194_s11  }
0x106b PF: > { %s2589_s9 = sand.u32 1, %s4149_s7   ;;  %p5215_p3 = scmp.ne.s32.totalorder %s5186_s13, 0 }
0x106c   : > { %p5216_p4 = scmp.ge.s32.totalorder %s4161_s30, 2  ;;  %s2590_s29 = scalar_lea.sflag [#allocation4], %s2589_s9 }
0x106e   : > { %p3351_p13 = pnand %p5216_p4, %p5215_p3 }
0x1070   : > { %p3352_p0 = pneg %p3351_p13 }
0x1072   : > { %4140 = dma.done.wait (%p3352_p0), %s2590_s29, 256  }
0x1073   : > { %4142 = vsyncadd (%p3352_p0), %s2590_s29, 4294967040  ;;  %s2599_s21 = scalar_lea.sflag [#allocation34], %s2589_s9 }
0x1074   : > { %4144 = dma.done.wait (%p3352_p0), %s2599_s21, 256  }
0x1075   : > { %4146 = vsyncadd (%p3352_p0), %s2599_s21, 4294967040  ;;  %p53_p9 = scmp.ge.s32.totalorder %s4559_s2, 4   ;;  %s5217_s7 = smov %s4153_s4 }
0x1076   : > { %s5218_s4 = smov %s4157_s8  ;;  %s5219_s8 = smov %s4570_s10 }
0x1077   : > { %s5220_s30 = smov %s4559_s2  ;;  %55 = sbr.rel (!%p53_p9) target bundleno = 41 (0x29), region = 265 }
0x107c   :  { %2604 = vsyncpa [#allocation3], 1 }
0x107d   :  { %2606 = vsyncpa [#allocation3 + $0x1], 1 }
0x107e   :  { %2607 = vsyncpa [#allocation6], 1 }
0x107f   :  { %2608 = vsyncpa [#allocation9], 1 }
0x1080   :  { %2609 = vsyncpa [#allocation12], 1 }
0x1081   :  { %2610 = vsyncpa [#allocation15], 1 }
0x1082   :  { %2611 = vsyncpa [#allocation18], 1 }
0x1083   :  { %2612 = vsyncpa [#allocation21], 1 }
0x1084   :  { %2613 = vsyncpa [#allocation24], 1 }
0x1085   :  { %2614 = vsyncpa [#allocation27], 1 }
0x1086   :  { %2615 = vsyncpa [#allocation30], 1 }
0x1087   :  { %2616 = vsyncpa [#allocation4], 1 }
0x1088   :  { %2618 = vsyncpa [#allocation4 + $0x1], 1 }
0x1089   :  { %2619 = vsyncpa [#allocation34], 1 }
0x108a   :  { %2621 = vsyncpa [#allocation34 + $0x1], 1 }

</bundles_post_ra>
